<compile_context>
chip_gen: v6e
topology: v6e:2x2x1
jax: 0.10.0
libtpu: 0.0.40
codegen_flags: <defaults>
</compile_context>

<pallas_src>
import math

import jax
import jax.numpy as jnp
from jax import lax
from jax.experimental import pallas as pl
from jax.experimental.pallas import tpu as pltpu

NEG = -1e9          # finite "masked" value (keeps fully-masked rows finite)
LN_EPS = 1e-5       # torch.nn.LayerNorm default

# Per-layer (stacked over L) parameters, in the order they are passed.
LAYER_PARAMS = (
    "ln1_g", "ln1_b", "w_qkv", "b_qkv", "w_so", "b_so",
    "ln2_g", "ln2_b", "w_q", "b_q", "w_kv", "b_kv", "w_co", "b_co",
    "ln3_g", "ln3_b", "w_f1", "b_f1", "w_f2", "b_f2",
)
FINAL_PARAMS = ("lnf_g", "lnf_b")
MATMUL_WEIGHTS = frozenset(
    {"w_qkv", "w_so", "w_q", "w_kv", "w_co", "w_f1", "w_f2"})
_NP = len(LAYER_PARAMS) + len(FINAL_PARAMS)


# ----------------------------------------------------------------------------
# One-layer kernel body (invoked once per (batch, layer) grid step)
# ----------------------------------------------------------------------------
def _make_layer_kernel(num_heads, compute_dtype):
    H = num_heads
    cdt = compute_dtype

    def kernel(*refs):
        x_ref, mem_ref, smaskT_ref, kpmT_ref = refs[0:4]
        P = dict(zip(LAYER_PARAMS + FINAL_PARAMS, refs[4:4 + _NP]))
        out_ref = refs[4 + _NP]
        x_state = refs[4 + _NP + 1]            # (T, D) residual stream carry
        mem_state = refs[4 + _NP + 2]          # (S, D) encoder memory carry

        T, D = x_state.shape
        S = mem_state.shape[0]
        dh = D // H
        scale = 1.0 / math.sqrt(dh)

        l = pl.program_id(1)

        # Load activations into VMEM scratch once per batch element.
        @pl.when(l == 0)
        def _():
            x_state[...] = x_ref[0]
            mem_state[...] = mem_ref[0]

        def layer_norm(z, gk, bk):
            mu = jnp.mean(z, axis=-1, keepdims=True)
            c = z - mu
            var = jnp.mean(c * c, axis=-1, keepdims=True)
            return c * lax.rsqrt(var + LN_EPS) * P[gk][0] + P[bk][0]

        def mm(a, wk, bk):
            # (n, K) @ (K, N) + bias, f32 accumulation; matmul inputs in cdt.
            w = P[wk][0]
            return (jnp.dot(a.astype(w.dtype), w,
                            preferred_element_type=jnp.float32) + P[bk][0])

        def heads_t(zT):
            # (D, n) -> (H, dh, n): pure leading-dim split of the transposed
            # activations (no lane shuffles; layout-preserving for dh % 8 == 0).
            return zT.reshape(H, dh, zT.shape[-1])

        def attention(qT, kT, vT, maskT):
            # qT: (D, Tq), kT/vT: (D, Tk); maskT additive, broadcastable to
            # (H, Tk, Tq).  All heads in two batched MXU matmuls.
            Tq = qT.shape[-1]
            qh = heads_t(qT).astype(cdt)                       # (H, dh, Tq)
            kh = jnp.swapaxes(heads_t(kT), 1, 2).astype(cdt)   # (H, Tk, dh)
            vh = heads_t(vT).astype(cdt)                       # (H, dh, Tk)
            # Scores held transposed per head: s[h, key, query].
            s = jnp.einsum("hkd,hdq->hkq", kh, qh,
                           preferred_element_type=jnp.float32)
            s = s + maskT
            s = s - jnp.max(s, axis=1, keepdims=True)
            p = jnp.exp(s)
            p = p / jnp.sum(p, axis=1, keepdims=True)
            oT = jnp.einsum("hdk,hkq->hdq", vh, p.astype(cdt),
                            preferred_element_type=jnp.float32)  # (H, dh, Tq)
            # combine_heads: leading-dim merge + one 2-D transpose.
            return oT.reshape(D, Tq).T                           # (Tq, D)

        x = x_state[...]
        mem = mem_state[...]
        smaskT = smaskT_ref[...][None]       # (1, T, T) additive, [key, query]
        mmaskT = kpmT_ref[...]               # (1, S, 1) additive key padding

        # ---- self-attention block (pre-norm + residual) ----
        h1 = layer_norm(x, "ln1_g", "ln1_b")
        qkvT = mm(h1, "w_qkv", "b_qkv").T                         # (3D, T)
        a = attention(qkvT[:D] * scale, qkvT[D:2 * D], qkvT[2 * D:], smaskT)
        x = x + mm(a, "w_so", "b_so")

        # ---- cross-attention block ----
        h2 = layer_norm(x, "ln2_g", "ln2_b")
        qT = mm(h2, "w_q", "b_q").T * scale                       # (D, T)
        kvT = mm(mem, "w_kv", "b_kv").T                           # (2D, S)
        a = attention(qT, kvT[:D], kvT[D:], mmaskT)
        x = x + mm(a, "w_co", "b_co")

        # ---- feed-forward block (fused ReLU) ----
        h3 = layer_norm(x, "ln3_g", "ln3_b")
        f = jnp.maximum(mm(h3, "w_f1", "b_f1"), 0.0)
        x = x + mm(f, "w_f2", "b_f2")

        x_state[...] = x

        # Final LayerNorm after the last layer; output block written back to
        # HBM once per batch element.
        @pl.when(l == pl.num_programs(1) - 1)
        def _():
            out_ref[0] = layer_norm(x, "lnf_g", "lnf_b")

    return kernel


# ----------------------------------------------------------------------------
# Wrapper: one pallas_call for the whole TransformerDecoder forward
# ----------------------------------------------------------------------------
def transformer_decoder(params, x, memory, mask, memory_key_padding, *,
                        num_heads, compute_dtype=jnp.float32,
                        vmem_limit_bytes=None):
    """x: (B,T,D), memory: (B,S,D), mask: (T,T) additive (mask[q,k], shared
    across batch), memory_key_padding: (B,S) additive mask over memory keys.
    compute_dtype: matmul-input dtype (jnp.bfloat16 recommended on v6e/v7x)."""
    B, T, D = x.shape
    S = memory.shape[1]
    L = params["w_qkv"].shape[0]
    assert D % num_heads == 0

    # Kernel-friendly mask layouts (scores are held as [head, key, query]).
    mask_t = jnp.asarray(mask, jnp.float32).T                       # (T, T)
    kpm_t = jnp.asarray(memory_key_padding, jnp.float32)[:, :, None]  # (B,S,1)

    weight_args, weight_specs = [], []
    for name in LAYER_PARAMS + FINAL_PARAMS:
        p = params[name]
        if p.ndim == 2:              # (N, X) -> (N, 1, X) so the block's last
            p = p[:, None, :]        # two dims equal the full array dims.
        if name in MATMUL_WEIGHTS:
            p = p.astype(compute_dtype)
        nd = p.ndim
        if name in FINAL_PARAMS:
            idx = lambda b, l, _n=nd: (0,) * _n
        else:
            idx = lambda b, l, _n=nd: (l,) + (0,) * (_n - 1)
        weight_args.append(p)
        weight_specs.append(pl.BlockSpec((1,) + p.shape[1:], idx))

    data_specs = [
        pl.BlockSpec((1, T, D), lambda b, l: (b, 0, 0)),   # x
        pl.BlockSpec((1, S, D), lambda b, l: (b, 0, 0)),   # memory
        pl.BlockSpec((T, T), lambda b, l: (0, 0)),         # shared self mask
        pl.BlockSpec((1, S, 1), lambda b, l: (b, 0, 0)),   # key-padding mask
    ]

    kernel = _make_layer_kernel(num_heads, compute_dtype)

    return pl.pallas_call(
        kernel,
        out_shape=jax.ShapeDtypeStruct((B, T, D), jnp.float32),
        grid_spec=pltpu.PrefetchScalarGridSpec(
            num_scalar_prefetch=0,
            grid=(B, L),
            in_specs=data_specs + weight_specs,
            out_specs=pl.BlockSpec((1, T, D), lambda b, l: (b, 0, 0)),
            scratch_shapes=[pltpu.VMEM((T, D), jnp.float32),
                            pltpu.VMEM((S, D), jnp.float32)],
        ),
        compiler_params=pltpu.CompilerParams(
            dimension_semantics=("parallel", "arbitrary"),
            vmem_limit_bytes=vmem_limit_bytes),
    )(x, memory, mask_t, kpm_t, *weight_args)


# ----------------------------------------------------------------------------
# Deterministic parameter init (stacked over layers; float32)
# ----------------------------------------------------------------------------
def init_params(key, num_layers, dim_model, dim_ffn):
    L, D, F = num_layers, dim_model, dim_ffn

    def xavier(k, shape):
        fan_in, fan_out = shape[-2], shape[-1]
        limit = math.sqrt(6.0 / (fan_in + fan_out))
        return jax.random.uniform(k, shape, jnp.float32, -limit, limit)

    ks = jax.random.split(key, 7)
    return {
        "ln1_g": jnp.ones((L, D), jnp.float32),
        "ln1_b": jnp.zeros((L, D), jnp.float32),
        "w_qkv": xavier(ks[0], (L, D, 3 * D)),
        "b_qkv": jnp.zeros((L, 3 * D), jnp.float32),
        "w_so": xavier(ks[1], (L, D, D)),
        "b_so": jnp.zeros((L, D), jnp.float32),
        "ln2_g": jnp.ones((L, D), jnp.float32),
        "ln2_b": jnp.zeros((L, D), jnp.float32),
        "w_q": xavier(ks[2], (L, D, D)),
        "b_q": jnp.zeros((L, D), jnp.float32),
        "w_kv": xavier(ks[3], (L, D, 2 * D)),
        "b_kv": jnp.zeros((L, 2 * D), jnp.float32),
        "w_co": xavier(ks[4], (L, D, D)),
        "b_co": jnp.zeros((L, D), jnp.float32),
        "ln3_g": jnp.ones((L, D), jnp.float32),
        "ln3_b": jnp.zeros((L, D), jnp.float32),
        "w_f1": xavier(ks[5], (L, D, F)),
        "b_f1": jnp.zeros((L, F), jnp.float32),
        "w_f2": xavier(ks[6], (L, F, D)),
        "b_f2": jnp.zeros((L, D), jnp.float32),
        "lnf_g": jnp.ones((1, D), jnp.float32),
        "lnf_b": jnp.zeros((1, D), jnp.float32),
    }


# ----------------------------------------------------------------------------
# Pure-JAX reference (for a correctness check of the fused kernel)
# ----------------------------------------------------------------------------
def _reference(params, x, memory, mask, kpm, num_heads):
    L = params["w_qkv"].shape[0]
    D = x.shape[-1]
    H = num_heads
    dh = D // H

    def ln(z, g, b):
        mu = z.mean(-1, keepdims=True)
        v = ((z - mu) ** 2).mean(-1, keepdims=True)
        return (z - mu) / jnp.sqrt(v + LN_EPS) * g + b

    def split(z):                      # (B, n, D) -> (B, H, n, dh)
        b_, n_ = z.shape[:2]
        return z.reshape(b_, n_, H, dh).transpose(0, 2, 1, 3)

    def attn(q, k, v, m):
        s = jnp.einsum("bhqd,bhkd->bhqk", q, k) / math.sqrt(dh) + m
        p = jax.nn.softmax(s, axis=-1)
        o = jnp.einsum("bhqk,bhkd->bhqd", p, v)
        return o.transpose(0, 2, 1, 3).reshape(o.shape[0], o.shape[2], D)

    for l in range(L):
        h = ln(x, params["ln1_g"][l], params["ln1_b"][l])
        qkv = h @ params["w_qkv"][l] + params["b_qkv"][l]
        q, k, v = (split(qkv[..., :D]), split(qkv[..., D:2 * D]),
                   split(qkv[..., 2 * D:]))
        x = x + attn(q, k, v, mask[None, None]) @ params["w_so"][l] \
            + params["b_so"][l]
        h = ln(x, params["ln2_g"][l], params["ln2_b"][l])
        q = split(h @ params["w_q"][l] + params["b_q"][l])
        kv = memory @ params["w_kv"][l] + params["b_kv"][l]
        k, v = split(kv[..., :D]), split(kv[..., D:])
        x = x + attn(q, k, v, kpm[:, None, None, :]) @ params["w_co"][l] \
            + params["b_co"][l]
        h = ln(x, params["ln3_g"][l], params["ln3_b"][l])
        f = jnp.maximum(h @ params["w_f1"][l] + params["b_f1"][l], 0.0)
        x = x + f @ params["w_f2"][l] + params["b_f2"][l]
    return ln(x, params["lnf_g"][0], params["lnf_b"][0])


# ----------------------------------------------------------------------------
# Main
# ----------------------------------------------------------------------------
if __name__ == "__main__":
    # small shapes consistent with the module
    B, T, S = 2, 8, 8
    num_layers, num_heads, dim_model, dim_ffn = 2, 4, 32, 64

    root = jax.random.PRNGKey(0)
    k_param, k_x, k_mem = jax.random.split(root, 3)
    params = init_params(k_param, num_layers, dim_model, dim_ffn)

    x = jax.random.normal(k_x, (B, T, dim_model), jnp.float32)
    memory = jax.random.normal(k_mem, (B, S, dim_model), jnp.float32)

    # causal additive mask (shared across the batch), [query, key] orientation
    causal = jnp.where(jnp.triu(jnp.ones((T, T), jnp.bool_), k=1),
                       NEG, 0.0).astype(jnp.float32)
    # memory key padding: mask the last memory position of batch element 1
    pad = jnp.zeros((B, S), jnp.bool_).at[1, S - 1].set(True)
    mem_kpm = jnp.where(pad, NEG, 0.0).astype(jnp.float32)

    out = transformer_decoder(params, x, memory, causal, mem_kpm,
                              num_heads=num_heads)
    out = jax.block_until_ready(out)

    assert out.shape == (B, T, dim_model)
    assert bool(jnp.all(jnp.isfinite(out)))

    ref = _reference(params, x, memory, causal, mem_kpm, num_heads)
    assert jnp.allclose(out, ref, atol=2e-2, rtol=2e-2), \
        float(jnp.max(jnp.abs(out - ref)))

    print("KERNEL_OK")
</pallas_src>

<mosaic_0001>
module attributes {stable_mosaic.version = 11 : i64} {
  func.func @kernel(%arg0: i32, %arg1: i32, %arg2: memref<1x8x32xf32, #tpu.memory_space<vmem>>, %arg3: memref<1x8x32xf32, #tpu.memory_space<vmem>>, %arg4: memref<8x8xf32, #tpu.memory_space<vmem>>, %arg5: memref<1x8x1xf32, #tpu.memory_space<vmem>>, %arg6: memref<1x1x32xf32, #tpu.memory_space<vmem>>, %arg7: memref<1x1x32xf32, #tpu.memory_space<vmem>>, %arg8: memref<1x32x96xf32, #tpu.memory_space<vmem>>, %arg9: memref<1x1x96xf32, #tpu.memory_space<vmem>>, %arg10: memref<1x32x32xf32, #tpu.memory_space<vmem>>, %arg11: memref<1x1x32xf32, #tpu.memory_space<vmem>>, %arg12: memref<1x1x32xf32, #tpu.memory_space<vmem>>, %arg13: memref<1x1x32xf32, #tpu.memory_space<vmem>>, %arg14: memref<1x32x32xf32, #tpu.memory_space<vmem>>, %arg15: memref<1x1x32xf32, #tpu.memory_space<vmem>>, %arg16: memref<1x32x64xf32, #tpu.memory_space<vmem>>, %arg17: memref<1x1x64xf32, #tpu.memory_space<vmem>>, %arg18: memref<1x32x32xf32, #tpu.memory_space<vmem>>, %arg19: memref<1x1x32xf32, #tpu.memory_space<vmem>>, %arg20: memref<1x1x32xf32, #tpu.memory_space<vmem>>, %arg21: memref<1x1x32xf32, #tpu.memory_space<vmem>>, %arg22: memref<1x32x64xf32, #tpu.memory_space<vmem>>, %arg23: memref<1x1x64xf32, #tpu.memory_space<vmem>>, %arg24: memref<1x64x32xf32, #tpu.memory_space<vmem>>, %arg25: memref<1x1x32xf32, #tpu.memory_space<vmem>>, %arg26: memref<1x1x32xf32, #tpu.memory_space<vmem>>, %arg27: memref<1x1x32xf32, #tpu.memory_space<vmem>>, %arg28: memref<1x8x32xf32, #tpu.memory_space<vmem>>, %arg29: memref<8x32xf32, #tpu.memory_space<vmem>>, %arg30: memref<8x32xf32, #tpu.memory_space<vmem>>) attributes {dimension_semantics = [#tpu.dimension_semantics<parallel>, #tpu.dimension_semantics<arbitrary>], iteration_bounds = array<i64: 2, 2>, scalar_prefetch = 0 : i64, scratch_operands = 2 : i64, tpu.core_type = #tpu.core_type<tc>, window_params = [{transform_indices = @transform_0, window_bounds = array<i64: 1, 8, 32>}, {transform_indices = @transform_1, window_bounds = array<i64: 1, 8, 32>}, {pipeline_mode = #tpu.pipeline_mode<synchronous>, transform_indices = @transform_2, window_bounds = array<i64: 8, 8>}, {transform_indices = @transform_3, window_bounds = array<i64: 1, 8, 1>}, {transform_indices = @transform_4, window_bounds = array<i64: 1, 1, 32>}, {transform_indices = @transform_5, window_bounds = array<i64: 1, 1, 32>}, {transform_indices = @transform_6, window_bounds = array<i64: 1, 32, 96>}, {transform_indices = @transform_7, window_bounds = array<i64: 1, 1, 96>}, {transform_indices = @transform_8, window_bounds = array<i64: 1, 32, 32>}, {transform_indices = @transform_9, window_bounds = array<i64: 1, 1, 32>}, {transform_indices = @transform_10, window_bounds = array<i64: 1, 1, 32>}, {transform_indices = @transform_11, window_bounds = array<i64: 1, 1, 32>}, {transform_indices = @transform_12, window_bounds = array<i64: 1, 32, 32>}, {transform_indices = @transform_13, window_bounds = array<i64: 1, 1, 32>}, {transform_indices = @transform_14, window_bounds = array<i64: 1, 32, 64>}, {transform_indices = @transform_15, window_bounds = array<i64: 1, 1, 64>}, {transform_indices = @transform_16, window_bounds = array<i64: 1, 32, 32>}, {transform_indices = @transform_17, window_bounds = array<i64: 1, 1, 32>}, {transform_indices = @transform_18, window_bounds = array<i64: 1, 1, 32>}, {transform_indices = @transform_19, window_bounds = array<i64: 1, 1, 32>}, {transform_indices = @transform_20, window_bounds = array<i64: 1, 32, 64>}, {transform_indices = @transform_21, window_bounds = array<i64: 1, 1, 64>}, {transform_indices = @transform_22, window_bounds = array<i64: 1, 64, 32>}, {transform_indices = @transform_23, window_bounds = array<i64: 1, 1, 32>}, {pipeline_mode = #tpu.pipeline_mode<synchronous>, transform_indices = @transform_24, window_bounds = array<i64: 1, 1, 32>}, {pipeline_mode = #tpu.pipeline_mode<synchronous>, transform_indices = @transform_25, window_bounds = array<i64: 1, 1, 32>}, {transform_indices = @transform_26, window_bounds = array<i64: 1, 8, 32>}]} {
    %c0_i32 = arith.constant 0 : i32
    %0 = arith.cmpi eq, %arg1, %c0_i32 : i32
    %1 = arith.extui %0 : i1 to i32
    %c0_i32_0 = arith.constant 0 : i32
    %2 = arith.cmpi ne, %1, %c0_i32_0 : i32
    scf.if %2 {
      %c0_104 = arith.constant 0 : index
      %c0_105 = arith.constant 0 : index
      %c0_106 = arith.constant 0 : index
      %188 = vector.load %arg2[%c0_104, %c0_105, %c0_106] : memref<1x8x32xf32, #tpu.memory_space<vmem>>, vector<1x8x32xf32>
      %189 = vector.shape_cast %188 : vector<1x8x32xf32> to vector<8x32xf32>
      %c0_107 = arith.constant 0 : index
      %c0_108 = arith.constant 0 : index
      %190 = vector.load %arg29[%c0_107, %c0_108] : memref<8x32xf32, #tpu.memory_space<vmem>>, vector<8x32xf32>
      tpu.vector_store %arg29[%c0_107, %c0_108], %189 {strides = array<i32>} : memref<8x32xf32, #tpu.memory_space<vmem>>, vector<8x32xf32>,
      %c0_109 = arith.constant 0 : index
      %c0_110 = arith.constant 0 : index
      %c0_111 = arith.constant 0 : index
      %191 = vector.load %arg3[%c0_109, %c0_110, %c0_111] : memref<1x8x32xf32, #tpu.memory_space<vmem>>, vector<1x8x32xf32>
      %192 = vector.shape_cast %191 : vector<1x8x32xf32> to vector<8x32xf32>
      %c0_112 = arith.constant 0 : index
      %c0_113 = arith.constant 0 : index
      %193 = vector.load %arg30[%c0_112, %c0_113] : memref<8x32xf32, #tpu.memory_space<vmem>>, vector<8x32xf32>
      tpu.vector_store %arg30[%c0_112, %c0_113], %192 {strides = array<i32>} : memref<8x32xf32, #tpu.memory_space<vmem>>, vector<8x32xf32>,
    } else {
    }
    %c0 = arith.constant 0 : index
    %c0_1 = arith.constant 0 : index
    %3 = vector.load %arg29[%c0, %c0_1] : memref<8x32xf32, #tpu.memory_space<vmem>>, vector<8x32xf32>
    %c0_2 = arith.constant 0 : index
    %c0_3 = arith.constant 0 : index
    %4 = vector.load %arg30[%c0_2, %c0_3] : memref<8x32xf32, #tpu.memory_space<vmem>>, vector<8x32xf32>
    %c0_4 = arith.constant 0 : index
    %c0_5 = arith.constant 0 : index
    %5 = vector.load %arg4[%c0_4, %c0_5] : memref<8x8xf32, #tpu.memory_space<vmem>>, vector<8x8xf32>
    %6 = vector.shape_cast %5 : vector<8x8xf32> to vector<1x8x8xf32>
    %c0_6 = arith.constant 0 : index
    %c0_7 = arith.constant 0 : index
    %c0_8 = arith.constant 0 : index
    %7 = vector.load %arg5[%c0_6, %c0_7, %c0_8] : memref<1x8x1xf32, #tpu.memory_space<vmem>>, vector<1x8x1xf32>
    %cst = arith.constant dense<0.000000e+00> : vector<8xf32>
    %8 = vector.multi_reduction <add>, %3, %cst [1] : vector<8x32xf32> to vector<8xf32>
    %9 = vector.shape_cast %8 : vector<8xf32> to vector<8x1xf32>
    %cst_9 = arith.constant 3.200000e+01 : f32
    %10 = vector.broadcast %cst_9 : f32 to vector<8x1xf32>
    %11 = arith.divf %9, %10 : vector<8x1xf32>
    %12 = vector.broadcast %11 : vector<8x1xf32> to vector<8x32xf32>
    %13 = arith.subf %3, %12 : vector<8x32xf32>
    %14 = arith.mulf %13, %13 : vector<8x32xf32>
    %cst_10 = arith.constant dense<0.000000e+00> : vector<8xf32>
    %15 = vector.multi_reduction <add>, %14, %cst_10 [1] : vector<8x32xf32> to vector<8xf32>
    %16 = vector.shape_cast %15 : vector<8xf32> to vector<8x1xf32>
    %cst_11 = arith.constant 3.200000e+01 : f32
    %17 = vector.broadcast %cst_11 : f32 to vector<8x1xf32>
    %18 = arith.divf %16, %17 : vector<8x1xf32>
    %cst_12 = arith.constant 9.99999974E-6 : f32
    %19 = vector.broadcast %cst_12 : f32 to vector<8x1xf32>
    %20 = arith.addf %18, %19 : vector<8x1xf32>
    %21 = math.rsqrt %20 : vector<8x1xf32>
    %22 = vector.broadcast %21 : vector<8x1xf32> to vector<8x32xf32>
    %23 = arith.mulf %13, %22 : vector<8x32xf32>
    %c0_13 = arith.constant 0 : index
    %c0_14 = arith.constant 0 : index
    %c0_15 = arith.constant 0 : index
    %24 = vector.load %arg6[%c0_13, %c0_14, %c0_15] : memref<1x1x32xf32, #tpu.memory_space<vmem>>, vector<1x1x32xf32>
    %25 = vector.shape_cast %24 : vector<1x1x32xf32> to vector<1x32xf32>
    %26 = vector.broadcast %25 : vector<1x32xf32> to vector<8x32xf32>
    %27 = arith.mulf %23, %26 : vector<8x32xf32>
    %c0_16 = arith.constant 0 : index
    %c0_17 = arith.constant 0 : index
    %c0_18 = arith.constant 0 : index
    %28 = vector.load %arg7[%c0_16, %c0_17, %c0_18] : memref<1x1x32xf32, #tpu.memory_space<vmem>>, vector<1x1x32xf32>
    %29 = vector.shape_cast %28 : vector<1x1x32xf32> to vector<1x32xf32>
    %30 = vector.broadcast %29 : vector<1x32xf32> to vector<8x32xf32>
    %31 = arith.addf %27, %30 : vector<8x32xf32>
    %c0_19 = arith.constant 0 : index
    %c0_20 = arith.constant 0 : index
    %c0_21 = arith.constant 0 : index
    %32 = vector.load %arg8[%c0_19, %c0_20, %c0_21] : memref<1x32x96xf32, #tpu.memory_space<vmem>>, vector<1x32x96xf32>
    %33 = vector.shape_cast %32 : vector<1x32x96xf32> to vector<32x96xf32>
    %cst_22 = arith.constant dense<0.000000e+00> : vector<8x96xf32>
    %34 = tpu.matmul %31, %33, %cst_22 {dimension_numbers = #tpu.dot_dimension_numbers<[1], [0], [0], [1], [0, 0, 1, 1], [], []>} : vector<8x32xf32>, vector<32x96xf32>, vector<8x96xf32> -> vector<8x96xf32>
    %c0_23 = arith.constant 0 : index
    %c0_24 = arith.constant 0 : index
    %c0_25 = arith.constant 0 : index
    %35 = vector.load %arg9[%c0_23, %c0_24, %c0_25] : memref<1x1x96xf32, #tpu.memory_space<vmem>>, vector<1x1x96xf32>
    %36 = vector.shape_cast %35 : vector<1x1x96xf32> to vector<1x96xf32>
    %37 = vector.broadcast %36 : vector<1x96xf32> to vector<8x96xf32>
    %38 = arith.addf %34, %37 : vector<8x96xf32>
    %39 = tpu.transpose %38, [1, 0] : vector<8x96xf32> -> vector<96x8xf32>
    %40 = vector.extract_strided_slice %39 {offsets = [0, 0], sizes = [32, 8], strides = [1, 1]} : vector<96x8xf32> to vector<32x8xf32>
    %cst_26 = arith.constant 0.353553385 : f32
    %41 = vector.broadcast %cst_26 : f32 to vector<32x8xf32>
    %42 = arith.mulf %40, %41 : vector<32x8xf32>
    %43 = vector.extract_strided_slice %39 {offsets = [32, 0], sizes = [32, 8], strides = [1, 1]} : vector<96x8xf32> to vector<32x8xf32>
    %44 = vector.extract_strided_slice %39 {offsets = [64, 0], sizes = [32, 8], strides = [1, 1]} : vector<96x8xf32> to vector<32x8xf32>
    %45 = vector.shape_cast %42 : vector<32x8xf32> to vector<4x8x8xf32>
    %46 = vector.shape_cast %43 : vector<32x8xf32> to vector<4x8x8xf32>
    %47 = tpu.transpose %46, [0, 2, 1] : vector<4x8x8xf32> -> vector<4x8x8xf32>
    %48 = vector.shape_cast %44 : vector<32x8xf32> to vector<4x8x8xf32>
    "tpu.trace_start"() <{level = 10 : i32, message = "hkd,hdq->hkq"}> : () -> ()
    %cst_27 = arith.constant dense<0.000000e+00> : vector<4x8x8xf32>
    %49 = tpu.matmul %47, %45, %cst_27 {dimension_numbers = #tpu.dot_dimension_numbers<[2], [1], [1], [2], [0, 0, 0, 1, 1, 2], [0], [0]>} : vector<4x8x8xf32>, vector<4x8x8xf32>, vector<4x8x8xf32> -> vector<4x8x8xf32>
    "tpu.trace_stop"() : () -> ()
    %50 = vector.broadcast %6 : vector<1x8x8xf32> to vector<4x8x8xf32>
    %51 = arith.addf %49, %50 : vector<4x8x8xf32>
    %cst_28 = arith.constant dense<0xFF800000> : vector<4x8xf32>
    %52 = vector.multi_reduction <maximumf>, %51, %cst_28 [1] : vector<4x8x8xf32> to vector<4x8xf32>
    %53 = vector.shape_cast %52 : vector<4x8xf32> to vector<4x1x8xf32>
    %54 = vector.broadcast %53 : vector<4x1x8xf32> to vector<4x8x8xf32>
    %55 = arith.subf %51, %54 : vector<4x8x8xf32>
    %56 = math.exp %55 : vector<4x8x8xf32>
    %cst_29 = arith.constant dense<0.000000e+00> : vector<4x8xf32>
    %57 = vector.multi_reduction <add>, %56, %cst_29 [1] : vector<4x8x8xf32> to vector<4x8xf32>
    %58 = vector.shape_cast %57 : vector<4x8xf32> to vector<4x1x8xf32>
    %59 = vector.broadcast %58 : vector<4x1x8xf32> to vector<4x8x8xf32>
    %60 = arith.divf %56, %59 : vector<4x8x8xf32>
    "tpu.trace_start"() <{level = 10 : i32, message = "hdk,hkq->hdq"}> : () -> ()
    %cst_30 = arith.constant dense<0.000000e+00> : vector<4x8x8xf32>
    %61 = tpu.matmul %48, %60, %cst_30 {dimension_numbers = #tpu.dot_dimension_numbers<[2], [1], [1], [2], [0, 0, 0, 1, 1, 2], [0], [0]>} : vector<4x8x8xf32>, vector<4x8x8xf32>, vector<4x8x8xf32> -> vector<4x8x8xf32>
    "tpu.trace_stop"() : () -> ()
    %62 = vector.shape_cast %61 : vector<4x8x8xf32> to vector<32x8xf32>
    %63 = tpu.transpose %62, [1, 0] : vector<32x8xf32> -> vector<8x32xf32>
    %c0_31 = arith.constant 0 : index
    %c0_32 = arith.constant 0 : index
    %c0_33 = arith.constant 0 : index
    %64 = vector.load %arg10[%c0_31, %c0_32, %c0_33] : memref<1x32x32xf32, #tpu.memory_space<vmem>>, vector<1x32x32xf32>
    %65 = vector.shape_cast %64 : vector<1x32x32xf32> to vector<32x32xf32>
    %cst_34 = arith.constant dense<0.000000e+00> : vector<8x32xf32>
    %66 = tpu.matmul %63, %65, %cst_34 {dimension_numbers = #tpu.dot_dimension_numbers<[1], [0], [0], [1], [0, 0, 1, 1], [], []>} : vector<8x32xf32>, vector<32x32xf32>, vector<8x32xf32> -> vector<8x32xf32>
    %c0_35 = arith.constant 0 : index
    %c0_36 = arith.constant 0 : index
    %c0_37 = arith.constant 0 : index
    %67 = vector.load %arg11[%c0_35, %c0_36, %c0_37] : memref<1x1x32xf32, #tpu.memory_space<vmem>>, vector<1x1x32xf32>
    %68 = vector.shape_cast %67 : vector<1x1x32xf32> to vector<1x32xf32>
    %69 = vector.broadcast %68 : vector<1x32xf32> to vector<8x32xf32>
    %70 = arith.addf %66, %69 : vector<8x32xf32>
    %71 = arith.addf %3, %70 : vector<8x32xf32>
    %cst_38 = arith.constant dense<0.000000e+00> : vector<8xf32>
    %72 = vector.multi_reduction <add>, %71, %cst_38 [1] : vector<8x32xf32> to vector<8xf32>
    %73 = vector.shape_cast %72 : vector<8xf32> to vector<8x1xf32>
    %cst_39 = arith.constant 3.200000e+01 : f32
    %74 = vector.broadcast %cst_39 : f32 to vector<8x1xf32>
    %75 = arith.divf %73, %74 : vector<8x1xf32>
    %76 = vector.broadcast %75 : vector<8x1xf32> to vector<8x32xf32>
    %77 = arith.subf %71, %76 : vector<8x32xf32>
    %78 = arith.mulf %77, %77 : vector<8x32xf32>
    %cst_40 = arith.constant dense<0.000000e+00> : vector<8xf32>
    %79 = vector.multi_reduction <add>, %78, %cst_40 [1] : vector<8x32xf32> to vector<8xf32>
    %80 = vector.shape_cast %79 : vector<8xf32> to vector<8x1xf32>
    %cst_41 = arith.constant 3.200000e+01 : f32
    %81 = vector.broadcast %cst_41 : f32 to vector<8x1xf32>
    %82 = arith.divf %80, %81 : vector<8x1xf32>
    %cst_42 = arith.constant 9.99999974E-6 : f32
    %83 = vector.broadcast %cst_42 : f32 to vector<8x1xf32>
    %84 = arith.addf %82, %83 : vector<8x1xf32>
    %85 = math.rsqrt %84 : vector<8x1xf32>
    %86 = vector.broadcast %85 : vector<8x1xf32> to vector<8x32xf32>
    %87 = arith.mulf %77, %86 : vector<8x32xf32>
    %c0_43 = arith.constant 0 : index
    %c0_44 = arith.constant 0 : index
    %c0_45 = arith.constant 0 : index
    %88 = vector.load %arg12[%c0_43, %c0_44, %c0_45] : memref<1x1x32xf32, #tpu.memory_space<vmem>>, vector<1x1x32xf32>
    %89 = vector.shape_cast %88 : vector<1x1x32xf32> to vector<1x32xf32>
    %90 = vector.broadcast %89 : vector<1x32xf32> to vector<8x32xf32>
    %91 = arith.mulf %87, %90 : vector<8x32xf32>
    %c0_46 = arith.constant 0 : index
    %c0_47 = arith.constant 0 : index
    %c0_48 = arith.constant 0 : index
    %92 = vector.load %arg13[%c0_46, %c0_47, %c0_48] : memref<1x1x32xf32, #tpu.memory_space<vmem>>, vector<1x1x32xf32>
    %93 = vector.shape_cast %92 : vector<1x1x32xf32> to vector<1x32xf32>
    %94 = vector.broadcast %93 : vector<1x32xf32> to vector<8x32xf32>
    %95 = arith.addf %91, %94 : vector<8x32xf32>
    %c0_49 = arith.constant 0 : index
    %c0_50 = arith.constant 0 : index
    %c0_51 = arith.constant 0 : index
    %96 = vector.load %arg14[%c0_49, %c0_50, %c0_51] : memref<1x32x32xf32, #tpu.memory_space<vmem>>, vector<1x32x32xf32>
    %97 = vector.shape_cast %96 : vector<1x32x32xf32> to vector<32x32xf32>
    %cst_52 = arith.constant dense<0.000000e+00> : vector<8x32xf32>
    %98 = tpu.matmul %95, %97, %cst_52 {dimension_numbers = #tpu.dot_dimension_numbers<[1], [0], [0], [1], [0, 0, 1, 1], [], []>} : vector<8x32xf32>, vector<32x32xf32>, vector<8x32xf32> -> vector<8x32xf32>
    %c0_53 = arith.constant 0 : index
    %c0_54 = arith.constant 0 : index
    %c0_55 = arith.constant 0 : index
    %99 = vector.load %arg15[%c0_53, %c0_54, %c0_55] : memref<1x1x32xf32, #tpu.memory_space<vmem>>, vector<1x1x32xf32>
    %100 = vector.shape_cast %99 : vector<1x1x32xf32> to vector<1x32xf32>
    %101 = vector.broadcast %100 : vector<1x32xf32> to vector<8x32xf32>
    %102 = arith.addf %98, %101 : vector<8x32xf32>
    %103 = tpu.transpose %102, [1, 0] : vector<8x32xf32> -> vector<32x8xf32>
    %cst_56 = arith.constant 0.353553385 : f32
    %104 = vector.broadcast %cst_56 : f32 to vector<32x8xf32>
    %105 = arith.mulf %103, %104 : vector<32x8xf32>
    %c0_57 = arith.constant 0 : index
    %c0_58 = arith.constant 0 : index
    %c0_59 = arith.constant 0 : index
    %106 = vector.load %arg16[%c0_57, %c0_58, %c0_59] : memref<1x32x64xf32, #tpu.memory_space<vmem>>, vector<1x32x64xf32>
    %107 = vector.shape_cast %106 : vector<1x32x64xf32> to vector<32x64xf32>
    %cst_60 = arith.constant dense<0.000000e+00> : vector<8x64xf32>
    %108 = tpu.matmul %4, %107, %cst_60 {dimension_numbers = #tpu.dot_dimension_numbers<[1], [0], [0], [1], [0, 0, 1, 1], [], []>} : vector<8x32xf32>, vector<32x64xf32>, vector<8x64xf32> -> vector<8x64xf32>
    %c0_61 = arith.constant 0 : index
    %c0_62 = arith.constant 0 : index
    %c0_63 = arith.constant 0 : index
    %109 = vector.load %arg17[%c0_61, %c0_62, %c0_63] : memref<1x1x64xf32, #tpu.memory_space<vmem>>, vector<1x1x64xf32>
    %110 = vector.shape_cast %109 : vector<1x1x64xf32> to vector<1x64xf32>
    %111 = vector.broadcast %110 : vector<1x64xf32> to vector<8x64xf32>
    %112 = arith.addf %108, %111 : vector<8x64xf32>
    %113 = tpu.transpose %112, [1, 0] : vector<8x64xf32> -> vector<64x8xf32>
    %114 = vector.extract_strided_slice %113 {offsets = [0, 0], sizes = [32, 8], strides = [1, 1]} : vector<64x8xf32> to vector<32x8xf32>
    %115 = vector.extract_strided_slice %113 {offsets = [32, 0], sizes = [32, 8], strides = [1, 1]} : vector<64x8xf32> to vector<32x8xf32>
    %116 = vector.shape_cast %105 : vector<32x8xf32> to vector<4x8x8xf32>
    %117 = vector.shape_cast %114 : vector<32x8xf32> to vector<4x8x8xf32>
    %118 = tpu.transpose %117, [0, 2, 1] : vector<4x8x8xf32> -> vector<4x8x8xf32>
    %119 = vector.shape_cast %115 : vector<32x8xf32> to vector<4x8x8xf32>
    "tpu.trace_start"() <{level = 10 : i32, message = "hkd,hdq->hkq"}> : () -> ()
    %cst_64 = arith.constant dense<0.000000e+00> : vector<4x8x8xf32>
    %120 = tpu.matmul %118, %116, %cst_64 {dimension_numbers = #tpu.dot_dimension_numbers<[2], [1], [1], [2], [0, 0, 0, 1, 1, 2], [0], [0]>} : vector<4x8x8xf32>, vector<4x8x8xf32>, vector<4x8x8xf32> -> vector<4x8x8xf32>
    "tpu.trace_stop"() : () -> ()
    %121 = vector.broadcast %7 : vector<1x8x1xf32> to vector<4x8x8xf32>
    %122 = arith.addf %120, %121 : vector<4x8x8xf32>
    %cst_65 = arith.constant dense<0xFF800000> : vector<4x8xf32>
    %123 = vector.multi_reduction <maximumf>, %122, %cst_65 [1] : vector<4x8x8xf32> to vector<4x8xf32>
    %124 = vector.shape_cast %123 : vector<4x8xf32> to vector<4x1x8xf32>
    %125 = vector.broadcast %124 : vector<4x1x8xf32> to vector<4x8x8xf32>
    %126 = arith.subf %122, %125 : vector<4x8x8xf32>
    %127 = math.exp %126 : vector<4x8x8xf32>
    %cst_66 = arith.constant dense<0.000000e+00> : vector<4x8xf32>
    %128 = vector.multi_reduction <add>, %127, %cst_66 [1] : vector<4x8x8xf32> to vector<4x8xf32>
    %129 = vector.shape_cast %128 : vector<4x8xf32> to vector<4x1x8xf32>
    %130 = vector.broadcast %129 : vector<4x1x8xf32> to vector<4x8x8xf32>
    %131 = arith.divf %127, %130 : vector<4x8x8xf32>
    "tpu.trace_start"() <{level = 10 : i32, message = "hdk,hkq->hdq"}> : () -> ()
    %cst_67 = arith.constant dense<0.000000e+00> : vector<4x8x8xf32>
    %132 = tpu.matmul %119, %131, %cst_67 {dimension_numbers = #tpu.dot_dimension_numbers<[2], [1], [1], [2], [0, 0, 0, 1, 1, 2], [0], [0]>} : vector<4x8x8xf32>, vector<4x8x8xf32>, vector<4x8x8xf32> -> vector<4x8x8xf32>
    "tpu.trace_stop"() : () -> ()
    %133 = vector.shape_cast %132 : vector<4x8x8xf32> to vector<32x8xf32>
    %134 = tpu.transpose %133, [1, 0] : vector<32x8xf32> -> vector<8x32xf32>
    %c0_68 = arith.constant 0 : index
    %c0_69 = arith.constant 0 : index
    %c0_70 = arith.constant 0 : index
    %135 = vector.load %arg18[%c0_68, %c0_69, %c0_70] : memref<1x32x32xf32, #tpu.memory_space<vmem>>, vector<1x32x32xf32>
    %136 = vector.shape_cast %135 : vector<1x32x32xf32> to vector<32x32xf32>
    %cst_71 = arith.constant dense<0.000000e+00> : vector<8x32xf32>
    %137 = tpu.matmul %134, %136, %cst_71 {dimension_numbers = #tpu.dot_dimension_numbers<[1], [0], [0], [1], [0, 0, 1, 1], [], []>} : vector<8x32xf32>, vector<32x32xf32>, vector<8x32xf32> -> vector<8x32xf32>
    %c0_72 = arith.constant 0 : index
    %c0_73 = arith.constant 0 : index
    %c0_74 = arith.constant 0 : index
    %138 = vector.load %arg19[%c0_72, %c0_73, %c0_74] : memref<1x1x32xf32, #tpu.memory_space<vmem>>, vector<1x1x32xf32>
    %139 = vector.shape_cast %138 : vector<1x1x32xf32> to vector<1x32xf32>
    %140 = vector.broadcast %139 : vector<1x32xf32> to vector<8x32xf32>
    %141 = arith.addf %137, %140 : vector<8x32xf32>
    %142 = arith.addf %71, %141 : vector<8x32xf32>
    %cst_75 = arith.constant dense<0.000000e+00> : vector<8xf32>
    %143 = vector.multi_reduction <add>, %142, %cst_75 [1] : vector<8x32xf32> to vector<8xf32>
    %144 = vector.shape_cast %143 : vector<8xf32> to vector<8x1xf32>
    %cst_76 = arith.constant 3.200000e+01 : f32
    %145 = vector.broadcast %cst_76 : f32 to vector<8x1xf32>
    %146 = arith.divf %144, %145 : vector<8x1xf32>
    %147 = vector.broadcast %146 : vector<8x1xf32> to vector<8x32xf32>
    %148 = arith.subf %142, %147 : vector<8x32xf32>
    %149 = arith.mulf %148, %148 : vector<8x32xf32>
    %cst_77 = arith.constant dense<0.000000e+00> : vector<8xf32>
    %150 = vector.multi_reduction <add>, %149, %cst_77 [1] : vector<8x32xf32> to vector<8xf32>
    %151 = vector.shape_cast %150 : vector<8xf32> to vector<8x1xf32>
    %cst_78 = arith.constant 3.200000e+01 : f32
    %152 = vector.broadcast %cst_78 : f32 to vector<8x1xf32>
    %153 = arith.divf %151, %152 : vector<8x1xf32>
    %cst_79 = arith.constant 9.99999974E-6 : f32
    %154 = vector.broadcast %cst_79 : f32 to vector<8x1xf32>
    %155 = arith.addf %153, %154 : vector<8x1xf32>
    %156 = math.rsqrt %155 : vector<8x1xf32>
    %157 = vector.broadcast %156 : vector<8x1xf32> to vector<8x32xf32>
    %158 = arith.mulf %148, %157 : vector<8x32xf32>
    %c0_80 = arith.constant 0 : index
    %c0_81 = arith.constant 0 : index
    %c0_82 = arith.constant 0 : index
    %159 = vector.load %arg20[%c0_80, %c0_81, %c0_82] : memref<1x1x32xf32, #tpu.memory_space<vmem>>, vector<1x1x32xf32>
    %160 = vector.shape_cast %159 : vector<1x1x32xf32> to vector<1x32xf32>
    %161 = vector.broadcast %160 : vector<1x32xf32> to vector<8x32xf32>
    %162 = arith.mulf %158, %161 : vector<8x32xf32>
    %c0_83 = arith.constant 0 : index
    %c0_84 = arith.constant 0 : index
    %c0_85 = arith.constant 0 : index
    %163 = vector.load %arg21[%c0_83, %c0_84, %c0_85] : memref<1x1x32xf32, #tpu.memory_space<vmem>>, vector<1x1x32xf32>
    %164 = vector.shape_cast %163 : vector<1x1x32xf32> to vector<1x32xf32>
    %165 = vector.broadcast %164 : vector<1x32xf32> to vector<8x32xf32>
    %166 = arith.addf %162, %165 : vector<8x32xf32>
    %c0_86 = arith.constant 0 : index
    %c0_87 = arith.constant 0 : index
    %c0_88 = arith.constant 0 : index
    %167 = vector.load %arg22[%c0_86, %c0_87, %c0_88] : memref<1x32x64xf32, #tpu.memory_space<vmem>>, vector<1x32x64xf32>
    %168 = vector.shape_cast %167 : vector<1x32x64xf32> to vector<32x64xf32>
    %cst_89 = arith.constant dense<0.000000e+00> : vector<8x64xf32>
    %169 = tpu.matmul %166, %168, %cst_89 {dimension_numbers = #tpu.dot_dimension_numbers<[1], [0], [0], [1], [0, 0, 1, 1], [], []>} : vector<8x32xf32>, vector<32x64xf32>, vector<8x64xf32> -> vector<8x64xf32>
    %c0_90 = arith.constant 0 : index
    %c0_91 = arith.constant 0 : index
    %c0_92 = arith.constant 0 : index
    %170 = vector.load %arg23[%c0_90, %c0_91, %c0_92] : memref<1x1x64xf32, #tpu.memory_space<vmem>>, vector<1x1x64xf32>
    %171 = vector.shape_cast %170 : vector<1x1x64xf32> to vector<1x64xf32>
    %172 = vector.broadcast %171 : vector<1x64xf32> to vector<8x64xf32>
    %173 = arith.addf %169, %172 : vector<8x64xf32>
    %cst_93 = arith.constant 0.000000e+00 : f32
    %174 = vector.broadcast %cst_93 : f32 to vector<8x64xf32>
    %175 = arith.maximumf %173, %174 : vector<8x64xf32>
    %c0_94 = arith.constant 0 : index
    %c0_95 = arith.constant 0 : index
    %c0_96 = arith.constant 0 : index
    %176 = vector.load %arg24[%c0_94, %c0_95, %c0_96] : memref<1x64x32xf32, #tpu.memory_space<vmem>>, vector<1x64x32xf32>
    %177 = vector.shape_cast %176 : vector<1x64x32xf32> to vector<64x32xf32>
    %cst_97 = arith.constant dense<0.000000e+00> : vector<8x32xf32>
    %178 = tpu.matmul %175, %177, %cst_97 {dimension_numbers = #tpu.dot_dimension_numbers<[1], [0], [0], [1], [0, 0, 1, 1], [], []>} : vector<8x64xf32>, vector<64x32xf32>, vector<8x32xf32> -> vector<8x32xf32>
    %c0_98 = arith.constant 0 : index
    %c0_99 = arith.constant 0 : index
    %c0_100 = arith.constant 0 : index
    %179 = vector.load %arg25[%c0_98, %c0_99, %c0_100] : memref<1x1x32xf32, #tpu.memory_space<vmem>>, vector<1x1x32xf32>
    %180 = vector.shape_cast %179 : vector<1x1x32xf32> to vector<1x32xf32>
    %181 = vector.broadcast %180 : vector<1x32xf32> to vector<8x32xf32>
    %182 = arith.addf %178, %181 : vector<8x32xf32>
    %183 = arith.addf %142, %182 : vector<8x32xf32>
    %c0_101 = arith.constant 0 : index
    %c0_102 = arith.constant 0 : index
    %184 = vector.load %arg29[%c0_101, %c0_102] : memref<8x32xf32, #tpu.memory_space<vmem>>, vector<8x32xf32>
    tpu.vector_store %arg29[%c0_101, %c0_102], %183 {strides = array<i32>} : memref<8x32xf32, #tpu.memory_space<vmem>>, vector<8x32xf32>,
    %c1_i32 = arith.constant 1 : i32
    %185 = arith.cmpi eq, %arg1, %c1_i32 : i32
    %186 = arith.extui %185 : i1 to i32
    %c0_i32_103 = arith.constant 0 : i32
    %187 = arith.cmpi ne, %186, %c0_i32_103 : i32
    scf.if %187 {
      %cst_104 = arith.constant dense<0.000000e+00> : vector<8xf32>
      %188 = vector.multi_reduction <add>, %183, %cst_104 [1] : vector<8x32xf32> to vector<8xf32>
      %189 = vector.shape_cast %188 : vector<8xf32> to vector<8x1xf32>
      %cst_105 = arith.constant 3.200000e+01 : f32
      %190 = vector.broadcast %cst_105 : f32 to vector<8x1xf32>
      %191 = arith.divf %189, %190 : vector<8x1xf32>
      %192 = vector.broadcast %191 : vector<8x1xf32> to vector<8x32xf32>
      %193 = arith.subf %183, %192 : vector<8x32xf32>
      %194 = arith.mulf %193, %193 : vector<8x32xf32>
      %cst_106 = arith.constant dense<0.000000e+00> : vector<8xf32>
      %195 = vector.multi_reduction <add>, %194, %cst_106 [1] : vector<8x32xf32> to vector<8xf32>
      %196 = vector.shape_cast %195 : vector<8xf32> to vector<8x1xf32>
      %cst_107 = arith.constant 3.200000e+01 : f32
      %197 = vector.broadcast %cst_107 : f32 to vector<8x1xf32>
      %198 = arith.divf %196, %197 : vector<8x1xf32>
      %cst_108 = arith.constant 9.99999974E-6 : f32
      %199 = vector.broadcast %cst_108 : f32 to vector<8x1xf32>
      %200 = arith.addf %198, %199 : vector<8x1xf32>
      %201 = math.rsqrt %200 : vector<8x1xf32>
      %202 = vector.broadcast %201 : vector<8x1xf32> to vector<8x32xf32>
      %203 = arith.mulf %193, %202 : vector<8x32xf32>
      %c0_109 = arith.constant 0 : index
      %c0_110 = arith.constant 0 : index
      %c0_111 = arith.constant 0 : index
      %204 = vector.load %arg26[%c0_109, %c0_110, %c0_111] : memref<1x1x32xf32, #tpu.memory_space<vmem>>, vector<1x1x32xf32>
      %205 = vector.shape_cast %204 : vector<1x1x32xf32> to vector<1x32xf32>
      %206 = vector.broadcast %205 : vector<1x32xf32> to vector<8x32xf32>
      %207 = arith.mulf %203, %206 : vector<8x32xf32>
      %c0_112 = arith.constant 0 : index
      %c0_113 = arith.constant 0 : index
      %c0_114 = arith.constant 0 : index
      %208 = vector.load %arg27[%c0_112, %c0_113, %c0_114] : memref<1x1x32xf32, #tpu.memory_space<vmem>>, vector<1x1x32xf32>
      %209 = vector.shape_cast %208 : vector<1x1x32xf32> to vector<1x32xf32>
      %210 = vector.broadcast %209 : vector<1x32xf32> to vector<8x32xf32>
      %211 = arith.addf %207, %210 : vector<8x32xf32>
      %c0_115 = arith.constant 0 : index
      %c0_116 = arith.constant 0 : index
      %c0_117 = arith.constant 0 : index
      %212 = vector.load %arg28[%c0_115, %c0_116, %c0_117] : memref<1x8x32xf32, #tpu.memory_space<vmem>>, vector<1x8x32xf32>
      %213 = vector.shape_cast %212 : vector<1x8x32xf32> to vector<8x32xf32>
      %214 = vector.shape_cast %211 : vector<8x32xf32> to vector<1x8x32xf32>
      tpu.vector_store %arg28[%c0_115, %c0_116, %c0_117], %214 {strides = array<i32>} : memref<1x8x32xf32, #tpu.memory_space<vmem>>, vector<1x8x32xf32>,
    } else {
    }
    return
  }
  func.func @transform_0(%arg0: i32, %arg1: i32) -> (i32, i32, i32) {
    %c0_i32 = arith.constant 0 : i32
    %c0_i32_0 = arith.constant 0 : i32
    %c0_i32_1 = arith.constant 0 : i32
    return %arg0, %c0_i32, %c0_i32_0 : i32, i32, i32
  }
  func.func @transform_1(%arg0: i32, %arg1: i32) -> (i32, i32, i32) {
    %c0_i32 = arith.constant 0 : i32
    %c0_i32_0 = arith.constant 0 : i32
    %c0_i32_1 = arith.constant 0 : i32
    return %arg0, %c0_i32, %c0_i32_0 : i32, i32, i32
  }
  func.func @transform_2(%arg0: i32, %arg1: i32) -> (i32, i32) {
    %c0_i32 = arith.constant 0 : i32
    %c0_i32_0 = arith.constant 0 : i32
    %c0_i32_1 = arith.constant 0 : i32
    return %c0_i32, %c0_i32_0 : i32, i32
  }
  func.func @transform_3(%arg0: i32, %arg1: i32) -> (i32, i32, i32) {
    %c0_i32 = arith.constant 0 : i32
    %c0_i32_0 = arith.constant 0 : i32
    %c0_i32_1 = arith.constant 0 : i32
    return %arg0, %c0_i32, %c0_i32_0 : i32, i32, i32
  }
  func.func @transform_4(%arg0: i32, %arg1: i32) -> (i32, i32, i32) {
    %c0_i32 = arith.constant 0 : i32
    %c0_i32_0 = arith.constant 0 : i32
    %c0_i32_1 = arith.constant 0 : i32
    return %arg1, %c0_i32, %c0_i32_0 : i32, i32, i32
  }
  func.func @transform_5(%arg0: i32, %arg1: i32) -> (i32, i32, i32) {
    %c0_i32 = arith.constant 0 : i32
    %c0_i32_0 = arith.constant 0 : i32
    %c0_i32_1 = arith.constant 0 : i32
    return %arg1, %c0_i32, %c0_i32_0 : i32, i32, i32
  }
  func.func @transform_6(%arg0: i32, %arg1: i32) -> (i32, i32, i32) {
    %c0_i32 = arith.constant 0 : i32
    %c0_i32_0 = arith.constant 0 : i32
    %c0_i32_1 = arith.constant 0 : i32
    return %arg1, %c0_i32, %c0_i32_0 : i32, i32, i32
  }
  func.func @transform_7(%arg0: i32, %arg1: i32) -> (i32, i32, i32) {
    %c0_i32 = arith.constant 0 : i32
    %c0_i32_0 = arith.constant 0 : i32
    %c0_i32_1 = arith.constant 0 : i32
    return %arg1, %c0_i32, %c0_i32_0 : i32, i32, i32
  }
  func.func @transform_8(%arg0: i32, %arg1: i32) -> (i32, i32, i32) {
    %c0_i32 = arith.constant 0 : i32
    %c0_i32_0 = arith.constant 0 : i32
    %c0_i32_1 = arith.constant 0 : i32
    return %arg1, %c0_i32, %c0_i32_0 : i32, i32, i32
  }
  func.func @transform_9(%arg0: i32, %arg1: i32) -> (i32, i32, i32) {
    %c0_i32 = arith.constant 0 : i32
    %c0_i32_0 = arith.constant 0 : i32
    %c0_i32_1 = arith.constant 0 : i32
    return %arg1, %c0_i32, %c0_i32_0 : i32, i32, i32
  }
  func.func @transform_10(%arg0: i32, %arg1: i32) -> (i32, i32, i32) {
    %c0_i32 = arith.constant 0 : i32
    %c0_i32_0 = arith.constant 0 : i32
    %c0_i32_1 = arith.constant 0 : i32
    return %arg1, %c0_i32, %c0_i32_0 : i32, i32, i32
  }
  func.func @transform_11(%arg0: i32, %arg1: i32) -> (i32, i32, i32) {
    %c0_i32 = arith.constant 0 : i32
    %c0_i32_0 = arith.constant 0 : i32
    %c0_i32_1 = arith.constant 0 : i32
    return %arg1, %c0_i32, %c0_i32_0 : i32, i32, i32
  }
  func.func @transform_12(%arg0: i32, %arg1: i32) -> (i32, i32, i32) {
    %c0_i32 = arith.constant 0 : i32
    %c0_i32_0 = arith.constant 0 : i32
    %c0_i32_1 = arith.constant 0 : i32
    return %arg1, %c0_i32, %c0_i32_0 : i32, i32, i32
  }
  func.func @transform_13(%arg0: i32, %arg1: i32) -> (i32, i32, i32) {
    %c0_i32 = arith.constant 0 : i32
    %c0_i32_0 = arith.constant 0 : i32
    %c0_i32_1 = arith.constant 0 : i32
    return %arg1, %c0_i32, %c0_i32_0 : i32, i32, i32
  }
  func.func @transform_14(%arg0: i32, %arg1: i32) -> (i32, i32, i32) {
    %c0_i32 = arith.constant 0 : i32
    %c0_i32_0 = arith.constant 0 : i32
    %c0_i32_1 = arith.constant 0 : i32
    return %arg1, %c0_i32, %c0_i32_0 : i32, i32, i32
  }
  func.func @transform_15(%arg0: i32, %arg1: i32) -> (i32, i32, i32) {
    %c0_i32 = arith.constant 0 : i32
    %c0_i32_0 = arith.constant 0 : i32
    %c0_i32_1 = arith.constant 0 : i32
    return %arg1, %c0_i32, %c0_i32_0 : i32, i32, i32
  }
  func.func @transform_16(%arg0: i32, %arg1: i32) -> (i32, i32, i32) {
    %c0_i32 = arith.constant 0 : i32
    %c0_i32_0 = arith.constant 0 : i32
    %c0_i32_1 = arith.constant 0 : i32
    return %arg1, %c0_i32, %c0_i32_0 : i32, i32, i32
  }
  func.func @transform_17(%arg0: i32, %arg1: i32) -> (i32, i32, i32) {
    %c0_i32 = arith.constant 0 : i32
    %c0_i32_0 = arith.constant 0 : i32
    %c0_i32_1 = arith.constant 0 : i32
    return %arg1, %c0_i32, %c0_i32_0 : i32, i32, i32
  }
  func.func @transform_18(%arg0: i32, %arg1: i32) -> (i32, i32, i32) {
    %c0_i32 = arith.constant 0 : i32
    %c0_i32_0 = arith.constant 0 : i32
    %c0_i32_1 = arith.constant 0 : i32
    return %arg1, %c0_i32, %c0_i32_0 : i32, i32, i32
  }
  func.func @transform_19(%arg0: i32, %arg1: i32) -> (i32, i32, i32) {
    %c0_i32 = arith.constant 0 : i32
    %c0_i32_0 = arith.constant 0 : i32
    %c0_i32_1 = arith.constant 0 : i32
    return %arg1, %c0_i32, %c0_i32_0 : i32, i32, i32
  }
  func.func @transform_20(%arg0: i32, %arg1: i32) -> (i32, i32, i32) {
    %c0_i32 = arith.constant 0 : i32
    %c0_i32_0 = arith.constant 0 : i32
    %c0_i32_1 = arith.constant 0 : i32
    return %arg1, %c0_i32, %c0_i32_0 : i32, i32, i32
  }
  func.func @transform_21(%arg0: i32, %arg1: i32) -> (i32, i32, i32) {
    %c0_i32 = arith.constant 0 : i32
    %c0_i32_0 = arith.constant 0 : i32
    %c0_i32_1 = arith.constant 0 : i32
    return %arg1, %c0_i32, %c0_i32_0 : i32, i32, i32
  }
  func.func @transform_22(%arg0: i32, %arg1: i32) -> (i32, i32, i32) {
    %c0_i32 = arith.constant 0 : i32
    %c0_i32_0 = arith.constant 0 : i32
    %c0_i32_1 = arith.constant 0 : i32
    return %arg1, %c0_i32, %c0_i32_0 : i32, i32, i32
  }
  func.func @transform_23(%arg0: i32, %arg1: i32) -> (i32, i32, i32) {
    %c0_i32 = arith.constant 0 : i32
    %c0_i32_0 = arith.constant 0 : i32
    %c0_i32_1 = arith.constant 0 : i32
    return %arg1, %c0_i32, %c0_i32_0 : i32, i32, i32
  }
  func.func @transform_24(%arg0: i32, %arg1: i32) -> (i32, i32, i32) {
    %c0_i32 = arith.constant 0 : i32
    %c0_i32_0 = arith.constant 0 : i32
    %c0_i32_1 = arith.constant 0 : i32
    %c0_i32_2 = arith.constant 0 : i32
    return %c0_i32, %c0_i32_0, %c0_i32_1 : i32, i32, i32
  }
  func.func @transform_25(%arg0: i32, %arg1: i32) -> (i32, i32, i32) {
    %c0_i32 = arith.constant 0 : i32
    %c0_i32_0 = arith.constant 0 : i32
    %c0_i32_1 = arith.constant 0 : i32
    %c0_i32_2 = arith.constant 0 : i32
    return %c0_i32, %c0_i32_0, %c0_i32_1 : i32, i32, i32
  }
  func.func @transform_26(%arg0: i32, %arg1: i32) -> (i32, i32, i32) {
    %c0_i32 = arith.constant 0 : i32
    %c0_i32_0 = arith.constant 0 : i32
    %c0_i32_1 = arith.constant 0 : i32
    return %arg0, %c0_i32, %c0_i32_0 : i32, i32, i32
  }
}

</mosaic_0001>

<bundles_post_ra>
// kernel: tpu_custom_call.1
= control target key start
LH: loop header
LB: loop body
LE: loop exit
PB: predicated region body
PF: predicated region fallthrough
CT: control target
= control target key end

     0   :  { %s5685_s0 = inlined_call_operand.vmem [shape: f32[2,8,32], index: 0, kind: input, shape index: {}]   ;;  %s5686_s1 = inlined_call_operand.hbm [shape: f32[2,8,32], index: 1, kind: input, shape index: {}]   ;;  %s5687_s2 = inlined_call_operand.hbm [shape: f32[8,8], index: 2, kind: input, shape index: {}]   ;;  %s5688_s3 = inlined_call_operand.vmem [shape: f32[2,8,1], index: 3, kind: input, shape index: {}]   ;;  %s5689_s4 = inlined_call_operand.vmem [shape: f32[2,1,32], index: 4, kind: input, shape index: {}]   ;;  %s5690_s5 = inlined_call_operand.vmem [shape: f32[2,1,32], index: 5, kind: input, shape index: {}]   ;;  %s5691_s6 = inlined_call_operand.vmem [shape: f32[2,32,96], index: 6, kind: input, shape index: {}]   ;;  %s5692_s7 = inlined_call_operand.vmem [shape: f32[2,1,96], index: 7, kind: input, shape index: {}]   ;;  %s5693_s8 = inlined_call_operand.vmem [shape: f32[2,32,32], index: 8, kind: input, shape index: {}]   ;;  %s5694_s9 = inlined_call_operand.vmem [shape: f32[2,1,32], index: 9, kind: input, shape index: {}]   ;;  %s5695_s10 = inlined_call_operand.vmem [shape: f32[2,1,32], index: 10, kind: input, shape index: {}]   ;;  %s5696_s11 = inlined_call_operand.vmem [shape: f32[2,1,32], index: 11, kind: input, shape index: {}]   ;;  %s5697_s12 = inlined_call_operand.vmem [shape: f32[2,32,32], index: 12, kind: input, shape index: {}]   ;;  %s5698_s13 = inlined_call_operand.vmem [shape: f32[2,1,32], index: 13, kind: input, shape index: {}]   ;;  %s5699_s14 = inlined_call_operand.hbm [shape: f32[2,32,64], index: 14, kind: input, shape index: {}]   ;;  %s5700_s15 = inlined_call_operand.vmem [shape: f32[2,1,64], index: 15, kind: input, shape index: {}]   ;;  %s5701_s16 = inlined_call_operand.hbm [shape: f32[2,32,32], index: 16, kind: input, shape index: {}]   ;;  %s5702_s17 = inlined_call_operand.vmem [shape: f32[2,1,32], index: 17, kind: input, shape index: {}]   ;;  %s5703_s18 = inlined_call_operand.vmem [shape: f32[2,1,32], index: 18, kind: input, shape index: {}]   ;;  %s5704_s19 = inlined_call_operand.vmem [shape: f32[2,1,32], index: 19, kind: input, shape index: {}]   ;;  %s5705_s20 = inlined_call_operand.hbm [shape: f32[2,32,64], index: 20, kind: input, shape index: {}]   ;;  %s5706_s21 = inlined_call_operand.vmem [shape: f32[2,1,64], index: 21, kind: input, shape index: {}]   ;;  %s5707_s22 = inlined_call_operand.vmem [shape: f32[2,64,32], index: 22, kind: input, shape index: {}]   ;;  %s5708_s23 = inlined_call_operand.vmem [shape: f32[2,1,32], index: 23, kind: input, shape index: {}]   ;;  %s5709_s24 = inlined_call_operand.vmem [shape: f32[1,1,32], index: 24, kind: input, shape index: {}]   ;;  %s5710_s25 = inlined_call_operand.vmem [shape: f32[1,1,32], index: 25, kind: input, shape index: {}]   ;;  %s5711_s26 = inlined_call_operand.hbm [shape: f32[2,8,32], index: 26, kind: output, shape index: {}]  }
   0x1   :  { %5734 = sst [smem:[#allocation33_spill]] %s5685_s0 }
   0x2   :  { %5735 = sst [smem:[#allocation34_spill]] %s5686_s1 }
   0x3   :  { %5736 = sst [smem:[#allocation35_spill]] %s5687_s2 }
   0x4   :  { %5737 = sst [smem:[#allocation36_spill]] %s5688_s3 }
   0x5   :  { %5738 = sst [smem:[#allocation37_spill]] %s5689_s4 }
   0x6   :  { %5739 = sst [smem:[#allocation38_spill]] %s5690_s5 }
   0x7   :  { %5740 = sst [smem:[#allocation39_spill]] %s5691_s6 }
   0x8   :  { %5741 = sst [smem:[#allocation40_spill]] %s5692_s7 }
   0x9   :  { %5742 = sst [smem:[#allocation41_spill]] %s5693_s8 }
   0xa   :  { %5743 = sst [smem:[#allocation42_spill]] %s5694_s9 }
   0xb   :  { %5744 = sst [smem:[#allocation43_spill]] %s5695_s10 }
   0xc   :  { %5745 = sst [smem:[#allocation44_spill]] %s5696_s11 }
   0xd   :  { %5746 = sst [smem:[#allocation45_spill]] %s5697_s12 }
   0xe   :  { %5747 = sst [smem:[#allocation46_spill]] %s5698_s13 }
   0xf   :  { %5748 = sst [smem:[#allocation47_spill]] %s5699_s14 }
  0x10   :  { %5749 = sst [smem:[#allocation48_spill]] %s5700_s15 }
  0x11   :  { %5750 = sst [smem:[#allocation49_spill]] %s5701_s16 }
  0x12   :  { %5751 = sst [smem:[#allocation50_spill]] %s5702_s17 }
  0x13   :  { %5752 = sst [smem:[#allocation51_spill]] %s5703_s18 }
  0x14   :  { %5753 = sst [smem:[#allocation52_spill]] %s5704_s19 }
  0x15   :  { %5754 = sst [smem:[#allocation53_spill]] %s5705_s20 }
  0x16   :  { %5755 = sst [smem:[#allocation54_spill]] %s5706_s21 }
  0x17   :  { %5756 = sst [smem:[#allocation55_spill]] %s5707_s22 }
  0x18   :  { %5757 = sst [smem:[#allocation56_spill]] %s5708_s23 }
  0x19   :  { %5758 = sst [smem:[#allocation57_spill]] %s5709_s24 }
  0x1a   :  { %5759 = sst [smem:[#allocation58_spill]] %s5710_s25 }
  0x1b   :  { %5760 = sst [smem:[#allocation59_spill]] %s5711_s26 }
  0x1c   :  { %31 = vsyncpa [#allocation5], 0 }
  0x1d   :  { %33 = vsyncpa [#allocation5 + $0x1], 0 }
  0x1e   :  { %34 = vsyncpa [#allocation8], 0 }
  0x1f   :  { %35 = vsyncpa [#allocation6], 0 }
  0x20   :  { %37 = vsyncpa [#allocation6 + $0x1], 0  ;;  %s4986_s27 = smov 0   ;;  %s4988_s3 = smov 0  }
  0x21   :  { %s4990_s7 = smov 0   ;;  %s4992_s28 = smov 0  }
  0x22   :  { %s4994_s8 = smov 0   ;;  %s4996_s4 = smov 0  }
  0x23   :  { %s4998_s29 = smov 0   ;;  %s5000_s0 = smov 0  }
  0x24   :  { %s5002_s9 = smov 0   ;;  %s5004_s30 = smov 0  }
  0x25   :  { %s5006_s2 = smov 0  }
  0x26 LB: > { %5761 = sst [smem:[#allocation17_spill]] %s4802_s3  ;;  %s52_s5 = sadd.s32 1, %s4830_s9  ;;  %s4838_s2 = sphi %s5006_s2, %s43_s2   ;;  %s4834_s30 = sphi %s5004_s30, %s5859_s30   ;;  %s4830_s9 = sphi %s5002_s9, %s5858_s9   ;;  %s4826_s0 = sphi %s5000_s0, %s5857_s0   ;;  %s4822_s29 = sphi %s4998_s29, %s5856_s29   ;;  %s4818_s4 = sphi %s4996_s4, %s5855_s4   ;;  %s4814_s8 = sphi %s4994_s8, %s5854_s8   ;;  %s4810_s28 = sphi %s4992_s28, %s5853_s28   ;;  %s4806_s7 = sphi %s4990_s7, %s5852_s7   ;;  %s4802_s3 = sphi %s4988_s3, %s5851_s3   ;;  %s4798_s27 = sphi %s4986_s27, %s5850_s27  }
  0x27   : > { %5762 = sst [smem:[#allocation18_spill]] %s4806_s7  ;;  %s55_s10 = sadd.s32 1, %s4834_s30 }
  0x28   : > { %5763 = sst [smem:[#allocation19_spill]] %s4810_s28  ;;  %p53_p0 = scmp.ge.s32.totalorder %s52_s5, 2 }
  0x29   : > { %5764 = sst [smem:[#allocation20_spill]] %s4814_s8  ;;  %s88_s6 = sadd.s32 1, %s4818_s4 }
  0x2a   : > { %5765 = sst [smem:[#allocation21_spill]] %s4818_s4  ;;  %p95_p1 = scmp.ne.s32.totalorder %s4818_s4, %s4814_s8 }
  0x2b   : > { %5766 = sst [smem:[#allocation22_spill]] %s4826_s0  ;;  %p96_p2 = scmp.eq.s32.totalorder %s4838_s2, 0 }
  0x2c   : > { %5767 = sst [smem:[#allocation23_spill]] %s4830_s9  ;;  %s5861_s5 = smov (%p53_p0, %s52_s5), 0 }
  0x2d   : > { %5768 = sst [smem:[#allocation24_spill]] %s4834_s30  ;;  %s5863_s10 = smov (!%p53_p0, %s55_s10), %s4834_s30 }
  0x2e   : > { %5769 = sst [smem:[#allocation25_spill]] %s4838_s2  ;;  %p5053_p3 = por %p96_p2, %p95_p1 }
  0x2f   : > { %5770 = sst [smem:[#allocation26_spill]] %s5861_s5  ;;  %s418_s26 = ssub.s32 %s4830_s9, %s5861_s5 }
  0x30   : > { %p57_p4 = scmp.ge.s32.totalorder %s5863_s10, 2  ;;  %p419_p5 = scmp.eq.s32.totalorder %s418_s26, 0 }
  0x31   : > { %s421_s25 = sadd.s32 1, %s4806_s7  ;;  %p428_p6 = scmp.ne.s32.totalorder %s4806_s7, %s4802_s3 }
  0x32   : > { %s5865_s10 = smov (%p57_p4, %s5863_s10), 0  ;;  %p4433_p9 = scmp.lt.s32.totalorder %s4838_s2, 4 }
  0x33   : > { %5772 = sst [smem:[#allocation27_spill]] %s5865_s10  ;;  %s85_s22 = ssub.s32 %s4834_s30, %s5865_s10 }
  0x34   : > { %s5065_s24 = scalar_select %p419_p5, %s4806_s7, %s421_s25  }
  0x35   : > { %p5069_p7 = por %p428_p6, %p96_p2  ;;  %p86_p8 = scmp.eq.s32.totalorder %s85_s22, 0 }
  0x36   : > { %5773 = sst [smem:[#allocation28_spill]] %s5065_s24  ;;  %s784_s5 = sand.u32 1, %s4838_s2  }
  0x37   : > { %s5076_s21 = scalar_select %p86_p8, %s4818_s4, %s88_s6  }
  0x38   : > { %s786_s26 = sand.u32 1, %s4818_s4   ;;  %s4083_s18 = sshll.u32 %s4834_s30, 7 }
  0x39   : > { %5775 = sst [smem:[#allocation29_spill]] %s5076_s21  ;;  %s4082_s19 = sshll.u32 %s786_s26, 3 }
  0x3a   : > { %s5776_s13 = sld [smem:[#allocation34_spill]]  ;;  %s788_s24 = scalar_lea.vmem [#allocation4], %s4082_s19 }
  0x3b   : > { %s795_s12 = sshll.u32 %s788_s24, 4  ;;  %p5085_p10 = pnand %p4433_p9, %p5053_p3  ;;  %s796_s12 = int_to_ptr.vmem [resolvable:$true] %s795_s12 }
  0x3c   : > { %p5091_p11 = pnand %p4433_p9, %p5069_p7  ;;  %s877_s6 = sand.u32 1, %s4806_s7  }
  0x3d   : > { %s5096_s26 = scalar_lea.sflag [#allocation5], %s784_s5  ;;  %p4574_p12 = pneg %p5085_p10 }
  0x3e   : > { %s4840_s15 = smov [#allocation4]  }
  0x3f   : > { %s4590_s17 = sshll.u32 %s4840_s15, 4  ;;  %s4591_s17 = int_to_ptr.vmem [resolvable:$false] %s4590_s17 }
  0x40   : > { %s793_s25 = scalar_lea.hbm %s5776_s13, %s4083_s18  ;;  %s4585_s13 = scalar_lea.vmem %s796_s12, 128 }
  0x41   : > { %p4586_p13 = scmp.ne.s32.totalorder %s796_s12, %s4585_s13  ;;  %s4592_s18 = scalar_lea.vmem %s4591_s17, 256 }
  0x42   : > { %p4593_p3 = scmp.lt.s32.totalorder %s796_s12, %s4591_s17  ;;  %p4594_p4 = scmp.lt.s32.totalorder %s4592_s18, %s4585_s13 }
  0x43   : > { %p4588_p0 = pnand %p4586_p13, %p4574_p12 }
  0x44   : > { %p4595_p5 = por %p4594_p4, %p4593_p3 }
  0x45   : > { %p4589_p2 = pneg %p4588_p0 }
  0x47   : > { %p4596_p6 = pnand %p4595_p5, %p4589_p2 }
  0x49   : > { %4599 = shalt.err (!%p4596_p6)
}
  0x4a   : > { %4418 = dma.hbm_to_vmem [thread:$0]  (!%p5085_p10), %s793_s25, 128, %s796_s12, %s5096_s26  }
  0x4b   : > { %s5103_s19 = sshll.u32 %s877_s6, 5  ;;  %s5106_s23 = sshll.u32 %s4830_s9, 9 }
  0x4c   : > { %s5779_s14 = sld [smem:[#allocation47_spill]]  ;;  %s879_s13 = scalar_lea.vmem [#allocation9], %s5103_s19 }
  0x4d   : > { %s886_s15 = sshll.u32 %s879_s13, 4  ;;  %p5716_p7 = pneg %p5091_p11  ;;  %s887_s15 = int_to_ptr.vmem [resolvable:$true] %s886_s15 }
  0x4e   : > { %s4613_s10 = scalar_lea.vmem %s887_s15, 512  ;;  %s4841_s12 = smov [#allocation9]  }
  0x4f   : > { %p4614_p8 = scmp.ne.s32.totalorder %s887_s15, %s4613_s10  ;;  %s4618_s25 = sshll.u32 %s4841_s12, 4  ;;  %s4619_s25 = int_to_ptr.vmem [resolvable:$false] %s4618_s25 }
  0x50   : > { %s4620_s6 = scalar_lea.vmem %s4619_s25, 1024  ;;  %p4621_p12 = scmp.lt.s32.totalorder %s887_s15, %s4619_s25 }
  0x51   : > { %p4616_p9 = pnand %p4614_p8, %p5716_p7  ;;  %p4622_p13 = scmp.lt.s32.totalorder %s4620_s6, %s4613_s10 }
  0x52   : > { %s885_s1 = scalar_lea.hbm %s5779_s14, %s5106_s23 }
  0x53   : > { %p4617_p10 = pneg %p4616_p9  ;;  %p4623_p0 = por %p4622_p13, %p4621_p12 }
  0x55   : > { %p4624_p2 = pnand %p4623_p0, %p4617_p10 }
  0x57   : > { %4627 = shalt.err (!%p4624_p2)
}
  0x58   : > { %s5717_s17 = smov 128   ;;  %s5718_s18 = smov 8  }
  0x59   : > { %4421 = dma.hbm_to_vmem [thread:$0]  (!%p5091_p11), %s885_s1, 512, %s887_s15, %s5096_s26, %s5717_s17, %s5717_s17, %s5718_s18  }
  0x5a   : > { %s5780_s16 = sld [smem:[#allocation49_spill]]  ;;  %s906_s10 = scalar_lea.vmem [#allocation10], %s5103_s19 }
  0x5b   : > { %s913_s12 = sshll.u32 %s906_s10, 4  ;;  %s4844_s6 = smov [#allocation10]   ;;  %s914_s12 = int_to_ptr.vmem [resolvable:$true] %s913_s12 }
  0x5c   : > { %s4641_s25 = scalar_lea.vmem %s914_s12, 512  ;;  %s4646_s14 = sshll.u32 %s4844_s6, 4  ;;  %s4647_s14 = int_to_ptr.vmem [resolvable:$false] %s4646_s14 }
  0x5d   : > { %p4642_p3 = scmp.ne.s32.totalorder %s914_s12, %s4641_s25  ;;  %s4648_s30 = scalar_lea.vmem %s4647_s14, 1024 }
  0x5e   : > { %p4649_p6 = scmp.lt.s32.totalorder %s914_s12, %s4647_s14  ;;  %p4650_p8 = scmp.lt.s32.totalorder %s4648_s30, %s4641_s25 }
  0x5f   : > { %p4644_p4 = pnand %p4642_p3, %p5716_p7 }
  0x60   : > { %s912_s13 = scalar_lea.hbm %s5780_s16, %s5106_s23  ;;  %p4651_p9 = por %p4650_p8, %p4649_p6 }
  0x61   : > { %p4645_p5 = pneg %p4644_p4 }
  0x63   : > { %p4652_p10 = pnand %p4651_p9, %p4645_p5 }
  0x65   : > { %4655 = shalt.err (!%p4652_p10)
}
  0x66   : > { %4424 = dma.hbm_to_vmem [thread:$0]  (!%p5091_p11), %s912_s13, 512, %s914_s12, %s5096_s26, %s5717_s17, %s5717_s17, %s5718_s18  }
  0x67   : > { %s5139_s14 = sadd.s32 4294967295, %s4838_s2   ;;  %s4078_s30 = sadd.s32 4294967294, %s4838_s2  }
  0x68   : > { %p101_p12 = scmp.ne.s32.totalorder %s4814_s8, %s4810_s28  ;;  %p102_p13 = scmp.eq.s32.totalorder %s5139_s14, 0 }
  0x69   : > { %p434_p0 = scmp.ne.s32.totalorder %s4802_s3, %s4798_s27  ;;  %p734_p2 = scmp.eq.s32.totalorder %s5139_s14, 3 }
  0x6a   : > { %p740_p3 = scmp.eq.s32.totalorder %s4078_s30, 3  ;;  %p5150_p4 = por %p102_p13, %p101_p12 }
  0x6b   : > { %p5156_p5 = por %p434_p0, %p102_p13  ;;  %p5163_p6 = por %p734_p2, %p95_p1 }
  0x6c   : > { %p5167_p8 = por %p740_p3, %p101_p12  ;;  %p4079_p9 = scmp.ge.s32.totalorder %s4838_s2, 1 }
  0x6d   : > { %s5782_s15 = scalar_select %p5156_p5, 1, 0 }
  0x6e   : > { %s5783_s24 = scalar_select %p5163_p6, 1, 0 }
  0x6f   : > { %s5785_s27 = scalar_select %p5167_p8, 1, 0 }
  0x70   : > { %5784 = sst [smem:[#allocation30_spill]] %s5783_s24  ;;  %p747_p10 = scmp.lt.s32.totalorder %s4838_s2, 5 }
  0x71   : > { %5786 = sst [smem:[#allocation31_spill]] %s5785_s27  ;;  %s4845_s13 = smov [#allocation7]  }
  0x72   : > { %p5173_p7 = pnand %p4079_p9, %p747_p10  ;;  %s760_s10 = sshll.u32 %s4845_s13, 4  ;;  %s5183_s10 = int_to_ptr.vmem [resolvable:$true] %s760_s10 }
  0x73   : > { %s5788_s20 = sld [smem:[#allocation53_spill]]  ;;  %s945_s30 = scalar_lea.vmem [#allocation11], %s5103_s19 }
  0x74   : > { %p4411_p0 = pneg %p5173_p7  ;;  %s952_s17 = sshll.u32 %s945_s30, 4  ;;  %s953_s17 = int_to_ptr.vmem [resolvable:$true] %s952_s17 }
  0x75   : > { %s4669_s16 = scalar_lea.vmem %s953_s17, 512  ;;  %p5790_p2 = pneg %p5091_p11 }
  0x76   : > { %p5188_p1 = pnand %p4411_p0, %p102_p13  ;;  %p4670_p12 = scmp.ne.s32.totalorder %s953_s17, %s4669_s16 }
  0x77   : > { %s4846_s13 = smov [#allocation11]  }
  0x78   : > { %p4672_p3 = pnand %p4670_p12, %p5790_p2  ;;  %s4674_s9 = sshll.u32 %s4846_s13, 4  ;;  %s4675_s9 = int_to_ptr.vmem [resolvable:$false] %s4674_s9 }
  0x79   : > { %s951_s6 = scalar_lea.hbm %s5788_s20, %s5106_s23  ;;  %s4676_s23 = scalar_lea.vmem %s4675_s9, 1024 }
  0x7a   : > { %p4673_p9 = pneg %p4672_p3  ;;  %p4677_p10 = scmp.lt.s32.totalorder %s953_s17, %s4675_s9 }
  0x7b   : > { %p4678_p8 = scmp.lt.s32.totalorder %s4676_s23, %s4669_s16 }
  0x7d   : > { %p4679_p6 = por %p4678_p8, %p4677_p10 }
  0x7f   : > { %p4680_p5 = pnand %p4679_p6, %p4673_p9 }
  0x81   : > { %4683 = shalt.err (!%p4680_p5)
}
  0x82   : > { %s5791_s19 = smov 8   ;;  %s5792_s12 = smov 128  }
  0x83   : > { %4427 = dma.hbm_to_vmem [thread:$0]  (!%p5091_p11), %s951_s6, 512, %s953_s17, %s5096_s26, %s5792_s12, %s5792_s12, %s5791_s19  }
  0x84   : > { %p4686_p0 = pneg %p5188_p1  ;;  %s4695_s25 = scalar_lea.vmem %s5183_s10, 128 }
  0x85   : > { %p4696_p12 = scmp.ne.s32.totalorder %s5183_s10, %s4695_s25  ;;  %p4703_p6 = scmp.lt.s32.totalorder %s5183_s10, %s5183_s10 }
  0x86   : > { %p4704_p5 = scmp.lt.s32.totalorder %s4695_s25, %s4695_s25 }
  0x87   : > { %p4698_p2 = pnand %p4696_p12, %p4686_p0 }
  0x88   : > { %p4705_p8 = por %p4704_p5, %p4703_p6 }
  0x89   : > { %p4699_p3 = pneg %p4698_p2 }
  0x8b   : > { %p4706_p9 = pnand %p4705_p8, %p4699_p3 }
  0x8d   : > { %4709 = shalt.err (!%p4706_p9)
}
  0x8e   : > { %s5793_s22 = sld [smem:[#allocation35_spill]] }
  0x90   : > { %984 = sbr.rel (%p5173_p7) target bundleno = 4176 (0x1050), region = 124 }
  0x94   : > { %4414 = dma.hbm_to_vmem [thread:$0]  (!%p5188_p1), %s5793_s22, 128, %s5183_s10, [#allocation8]  }
  0x95   : > { %s986_s26 = sand.u32 1, %s5139_s14   ;;  %s5722_s17 = sand.u32 1, %s4814_s8  }
  0x96   : > { %s5219_s6 = sshll.u32 %s5722_s17, 3  ;;  %s987_s30 = scalar_lea.sflag [#allocation5], %s986_s26 }
  0x97   : > { %4781 = dma.done.wait (%p5150_p4), %s987_s30, 128  }
  0x98   : > { %4783 = vsyncadd (%p5150_p4), %s987_s30, 4294967168 }
  0x99   : > { %4785 = dma.done.wait (%p102_p13), [#allocation8], 128  }
  0x9a   : > { %4787 = vsyncadd (%p102_p13), [#allocation8], 4294967168  ;;  %s1001_s5 = sand.u32 1, %s4802_s3   ;;  %p5794_p11 = scmp.ne.s32.totalorder %s5782_s15, 0 }
  0x9b   : > { %s5231_s10 = sshll.u32 %s1001_s5, 5 }
  0x9c   : > { %s5234_s13 = scalar_lea.vmem [#allocation9], %s5231_s10 }
  0x9d   : > { %4789 = dma.done.wait (%p5794_p11), %s987_s30, 1536  }
  0x9e   : > { %4791 = vsyncadd (%p5794_p11), %s987_s30, 4294965760  ;;  %p1172_p7 = scmp.lt.s32.totalorder %s4826_s0, 1  ;;  %p1180_p4 = scmp.lt.s32.totalorder %s4822_s29, 1 }
  0x9f   : > { %s5795_s12 = sld [smem:[#allocation33_spill]]  ;;  %s5332_s3 = scalar_lea.vmem [#allocation11], %s5231_s10 }
  0xa0   : > { %s1173_s14 = scalar_select %p1172_p7, %s4826_s0, 1 }
  0xa1   : > { %s5244_s1 = scalar_select %p1180_p4, %s4822_s29, 1 }
  0xa2   : > { %s4100_s15 = sshll.u32 %s1173_s14, 3  ;;  %s5796_s22 = sld [smem:[#allocation36_spill]] }
  0xa3   : > { %s4157_s23 = sshll.u32 %s5244_s1, 5  ;;  %s5802_s17 = sld [smem:[#allocation41_spill]] }
  0xa4   : > { %s5806_s2 = sld [smem:[#allocation45_spill]]  ;;  %p4110_p13 = scmp.ne.s32.totalorder %s4822_s29, 0 }
  0xa5   : > { %s1175_s25 = scalar_lea.vmem %s5795_s12, %s4100_s15  ;;  %s5809_s19 = sld [smem:[#allocation50_spill]] }
  0xa6   : > { %s5810_s16 = sld [smem:[#allocation51_spill]]  ;;  %s5329_s12 = scalar_lea.vmem [#allocation10], %s5231_s10 }
  0xa7   : > { %s5812_s5 = sld [smem:[#allocation54_spill]]  ;;  %s5815_s11 = scalar_lea.vmem (!%p4110_p13), [#allocation4], %s5219_s6 }
  0xa8   : > { %s5252_s26 = scalar_lea.vmem %s5796_s22, %s4100_s15  ;;  %s5801_s15 = sld [smem:[#allocation39_spill]] }
  0xa9   : > { %5797 = sst [smem:[#allocation32_spill]] %s5252_s26  ;;  %s5275_s18 = scalar_lea.vmem %s5802_s17, %s4157_s23 }
  0xaa   : > { %s5292_s30 = scalar_lea.vmem %s5806_s2, %s4157_s23  ;;  %s5811_s2 = sld [smem:[#allocation52_spill]] }
  0xab   : > { %s1221_s7 = scalar_lea.vmem %s5809_s19, %s5244_s1  ;;  %s4160_s17 = sshll.u32 %s5244_s1, 6 }
  0xac   : > { %s1224_s9 = scalar_lea.vmem %s5810_s16, %s5244_s1  ;;  %s5813_s21 = sld [smem:[#allocation56_spill]] }
  0xad   : > { %s1230_s24 = scalar_lea.vmem %s5812_s5, %s5244_s1  ;;  %s5814_s27 = sld [smem:[#allocation55_spill]] }
  0xae   : > { %s5270_s22 = scalar_lea.vmem %s5801_s15, %s4157_s23  ;;  %s1171_s26 = scalar_lea.vmem [#allocation12], %s5219_s6 }
  0xaf   : > { %1242 = sbr.rel (%p4110_p13) target bundleno = 182 (0xb6), region = 148 }
  0xb0   : > { %s1227_s23 = scalar_lea.vmem %s5811_s2, %s5244_s1 }
  0xb2   : > { %s1238_s4 = scalar_lea.vmem %s5813_s21, %s5244_s1 }
  0xb3   : > { %s5326_s19 = scalar_lea.vmem %s5814_s27, %s4160_s17 }
  0xb4   : > { %v1243_v0 = vld [vmem:[%s1175_s25] sm:$0xff]  ;;  %vm1244_vm0 = vcmask 261120   ;;  %v1246_v1 = vld [vmem:[%s5815_s11] sm:$0xff] }
  0xb5   : > { %1245 = vst.msk [vmem:[#allocation2] sm:$0xff] %vm1244_vm0, %v1243_v0  ;;  %1247 = vst.msk [vmem:[#allocation3] sm:$0xff] %vm1244_vm0, %v1246_v1 }
  0xb6 PF: > { %vm1252_vm1 = vcmask 261120   ;;  %v1286_v9 = vld [vmem:[%s5270_s22 + $0x18] sm:$0xff]  ;;  %v4847_v10 = vmov 0.0   ;;  %v1285_v11 = vld [vmem:[%s5270_s22 + $0x10] sm:$0xff]  ;;  %vm4848_vm2 = vmmov 0   ;;  %v1284_v12 = vld [vmem:[%s5270_s22 + $0x8] sm:$0xff] }
  0xb7   : > { %4232 = vmatprep.subr.mxu0 %v4847_v10  ;;  %4240 = vmatprep.mubr.msk.f32.mxu0 %vm4848_vm2, %v4847_v10  ;;  %v1283_v13 = vld [vmem:[%s5270_s22] sm:$0xff]  ;;  %s5816_s25 = sld [smem:[#allocation37_spill]]  ;;  %vm1531_vm3 = vcmask 64512   ;;  %vm3613_vm4 = vcmask 523264   ;;  %p4147_p1 = scmp.ne.s32.totalorder %s4822_s29, 1 }
  0xb8   : > { %4233 = vmatpush3.msra.mxu0 %v1286_v9  ;;  %4243 = vmatprep.subr.mxu1 %v4847_v10  ;;  %s5818_s28 = sld [smem:[#allocation38_spill]]  ;;  %v1250_v47 = vld [vmem:[#allocation7] sm:$0xff] }
  0xb9   : > { %4234 = vmatprep.subr.mxu0 %v4847_v10  ;;  %4245 = vmatprep.mubr.msk.f32.mxu1 %vm4848_vm2, %v4847_v10  ;;  %s5820_s17 = sld [smem:[#allocation40_spill]] }
  0xba   : > { %4235 = vmatpush3.msra.mxu0 %v1285_v11  ;;  %s5822_s0 = sld [smem:[#allocation42_spill]] }
  0xbb   : > { %4236 = vmatprep.subr.mxu0 %v4847_v10  ;;  %s5824_s8 = sld [smem:[#allocation48_spill]] }
  0xbc   : > { %v5338_v2 = vld [vmem:[#allocation2] sm:$0xff]  ;;  %4237 = vmatpush3.msra.mxu0 %v1284_v12  ;;  %s5830_s5 = sld [smem:[#allocation32_spill]] }
  0xbd   : > { %v1253_v3 = vsel %vm1252_vm1, %v5338_v2, 0.0  ;;  %4238 = vmatprep.subr.mxu0 %v4847_v10  ;;  %s5817_s14 = scalar_lea.vmem %s5816_s25, %s5244_s1  ;;  %s5838_s29 = sld [smem:[#allocation57_spill]] (!%p4147_p1) }
  0xbe   : > { %1254 = vadd.xlane.f32.xlu0 %v1253_v3  ;;  %4239 = vmatpush3.msra.mxu0 %v1283_v13  ;;  %v4111_v18 = vld [vmem:[%s5817_s14] ss:$0 sm:$0xff]  ;;  %s5819_s2 = scalar_lea.vmem %s5818_s28, %s5244_s1  ;;  %s5826_s14 = sld [smem:[#allocation43_spill]] }
  0xbf   : > { %4258 = vmatprep.subr.mxu0 %v4847_v10  ;;  %v4112_v20 = vld [vmem:[%s5819_s2] ss:$0 sm:$0xff]  ;;  %s5821_s20 = scalar_lea.vmem %s5820_s17, %s5244_s1  ;;  %s5828_s2 = sld [smem:[#allocation44_spill]] }
  0xc0   : > { %v4113_v23 = vld [vmem:[%s5821_s20] ss:$0 sm:$0xff]  ;;  %s5823_s27 = scalar_lea.vmem %s5822_s0, %s5244_s1  ;;  %s5839_s22 = sld [smem:[#allocation58_spill]] (!%p4147_p1) }
  0xc1   : > { %s5825_s10 = scalar_lea.vmem %s5824_s8, %s5244_s1 }
  0xc4   : > { %s5827_s16 = scalar_lea.vmem %s5826_s14, %s5244_s1 }
  0xc5   : > { %s5829_s15 = scalar_lea.vmem %s5828_s2, %s5244_s1 }
 0x147   : > { %v1255_v4 = vpop.xlane.xlu0 %1254 }
 0x148   : > { %v1257_v5 = vmul.f32 0.03125, %v1255_v4 }
 0x14a   : > { %v1258_v6 = vsub.f32 %v5338_v2, %v1257_v5 }
 0x14c   : > { %v1259_v7 = vmul.f32 %v1258_v6, %v1258_v6 }
 0x14e   : > { %v1260_v8 = vsel %vm1252_vm1, %v1259_v7, 0.0 }
 0x14f   : > { %1261 = vadd.xlane.f32.xlu0 %v1260_v8 }
 0x1d8   : > { %v1262_v14 = vpop.xlane.xlu0 %1261 }
 0x1d9   : > { %v1263_v15 = vmul.f32 0.03125, %v1262_v14 }
 0x1db   : > { %v1264_v16 = vadd.f32 1e-05, %v1263_v15 }
 0x1dd   : > { %4532 = vrsqrt.f32 %v1264_v16 }
 0x1ea   : > { %v4533_v17 = vpop.eup %4532 }
 0x1eb   : > { %v1266_v19 = vmul.f32 %v4533_v17, %v1258_v6 }
 0x1ed   : > { %v1274_v21 = vmul.f32 %v4111_v18, %v1266_v19 }
 0x1ef   : > { %v1282_v22 = vadd.f32 %v4112_v20, %v1274_v21 }
 0x1f1   : > { %4241 = vmatmul.mubr.msk.f32.vlgmr.msra.gmra.mxu0 %vm1252_vm1, %v1282_v22 }
 0x1f2   : > { %4260 = vmatprep.mubr.msk.f32.mxu0 %vm4848_vm2, %v4847_v10 }
 0x2b1   : > { %v1363_v24 = vpop.f32.mrf.mxu0 }
 0x2b2   : > { %v1364_v25 = vadd.f32 %v4113_v23, %v1363_v24 }
 0x2b3   : > { %v4242_v26 = vpop.f32.mrf.mxu0 }
 0x2b4   : > { %1367 = vxpose.xlu1.b32.start.end [1/1] (short) (narrow) %v1364_v25, 96 }
 0x330   : > { %v1383_v27 = vpop.trf.xlu1 }
 0x331   : > { %v1399_v28 = vmul.f32 0.35355338, %v1383_v27 }
 0x333   : > { %4244 = vmatpush3.msra.mxu1 %v1399_v28 }
 0x334   : > { %v1384_v29 = vpop.trf.xlu1  ;;  %4248 = vmatprep.subr.mxu1 %v4847_v10 }
 0x335   : > { %v1400_v41 = vmul.f32 0.35355338, %v1384_v29 }
 0x338   : > { %v1385_v30 = vpop.trf.xlu1 }
 0x339   : > { %v1401_v43 = vmul.f32 0.35355338, %v1385_v30 }
 0x33c   : > { %v1386_v31 = vpop.trf.xlu1 }
 0x33d   : > { %v1402_v32 = vmul.f32 0.35355338, %v1386_v31 }
 0x33f   : > { %4259 = vmatpush3.msra.mxu0 %v1402_v32 }
 0x340   : > { %v1387_v33 = vpop.trf.xlu1  ;;  %4268 = vmatprep.subr.mxu0 %v4847_v10 }
 0x341   : > { %1403 = vxpose.xlu1.b32.start.end [1/1] (short) (narrow) %v1387_v33, 8 }
 0x344   : > { %v1388_v34 = vpop.trf.xlu1 }
 0x345   : > { %1435 = vxpose.xlu0.b32.start.end [1/1] (short) (narrow) %v1388_v34, 8 }
 0x348   : > { %v1389_v35 = vpop.trf.xlu1 }
 0x349   : > { %1467 = vxpose.xlu1.b32.start.end [1/1] (short) (narrow) %v1389_v35, 8 }
 0x34c   : > { %v1390_v36 = vpop.trf.xlu1 }
 0x34d   : > { %1499 = vxpose.xlu0.b32.start.end [1/1] (short) (narrow) %v1390_v36, 8 }
 0x350   : > { %v5378_v37 = vpop.trf.xlu1 }
 0x354   : > { %v5380_v38 = vpop.trf.xlu1 }
 0x358   : > { %v5382_v39 = vpop.trf.xlu1 }
 0x35c   : > { %v5384_v40 = vpop.trf.xlu1 }
 0x3bd   : > { %v1419_v42 = vpop.trf.xlu1 }
 0x3be   : > { %4246 = vmatmul.mubr.msk.f32.vlgmr.msra.gmra.mxu1 %vm1531_vm3, %v1419_v42 }
 0x3bf   : > { %4249 = vmatpush3.msra.mxu1 %v1400_v41  ;;  %4250 = vmatprep.mubr.msk.f32.mxu1 %vm4848_vm2, %v4847_v10 }
 0x3c0   : > { %4253 = vmatprep.subr.mxu1 %v4847_v10 }
 0x3c1   : > { %v1451_v44 = vpop.trf.xlu0 }
 0x3c2   : > { %4251 = vmatmul.mubr.msk.f32.vlgmr.msra.gmra.mxu1 %vm1531_vm3, %v1451_v44 }
 0x3c3   : > { %4254 = vmatpush3.msra.mxu1 %v1401_v43  ;;  %4255 = vmatprep.mubr.msk.f32.mxu1 %vm4848_vm2, %v4847_v10 }
 0x3c4   : > { %4263 = vmatprep.subr.mxu1 %v4847_v10 }
 0x3c5   : > { %v1483_v45 = vpop.trf.xlu1 }
 0x3c6   : > { %4256 = vmatmul.mubr.msk.f32.vlgmr.msra.gmra.mxu1 %vm1531_vm3, %v1483_v45 }
 0x3c7   : > { %4265 = vmatprep.mubr.msk.f32.mxu1 %vm4848_vm2, %v4847_v10 }
 0x3c9   : > { %v1515_v46 = vpop.trf.xlu0 }
 0x3ca   : > { %4261 = vmatmul.mubr.msk.f32.vlgmr.msra.gmra.mxu0 %vm1531_vm3, %v1515_v46 }
 0x3cb   : > { %4270 = vmatprep.mubr.msk.f32.mxu0 %vm4848_vm2, %v4847_v10 }
 0x47e   : > { %v1601_v48 = vpop.f32.mrf.mxu1 }
 0x47f   : > { %v1602_v49 = vadd.f32 %v1601_v48, %v1250_v47 }
 0x480   : > { %v4247_v50 = vpop.f32.mrf.mxu1 }
 0x481   : > { %v1824_v51 = vsel %vm1531_vm3, %v1602_v49, -inf }
 0x482   : > { %v1825_v52 = vrot.slane %v1824_v51, 4  ;;  %v1674_v53 = vpop.f32.mrf.mxu1 }
 0x483   : > { %v1675_v54 = vadd.f32 %v1674_v53, %v1250_v47 }
 0x484   : > { %v1826_v55 = vmax.f32 %v1824_v51, %v1825_v52  ;;  %v4252_v56 = vpop.f32.mrf.mxu1 }
 0x485   : > { %v1831_v57 = vsel %vm1531_vm3, %v1675_v54, -inf }
 0x486   : > { %v1827_v58 = vrot.slane %v1826_v55, 2  ;;  %v1832_v59 = vrot.slane %v1831_v57, 4  ;;  %v1747_v60 = vpop.f32.mrf.mxu1 }
 0x487   : > { %v1748_v61 = vadd.f32 %v1747_v60, %v1250_v47 }
 0x488   : > { %v1828_v62 = vmax.f32 %v1826_v55, %v1827_v58  ;;  %v1833_v63 = vmax.f32 %v1831_v57, %v1832_v59  ;;  %v4257_v0 = vpop.f32.mrf.mxu1 }
 0x489   : > { %v1838_v1 = vsel %vm1531_vm3, %v1748_v61, -inf }
 0x48a   : > { %v1829_v3 = vrot.slane %v1828_v62, 1  ;;  %v1834_v4 = vrot.slane %v1833_v63, 2  ;;  %v1839_v5 = vrot.slane %v1838_v1, 4  ;;  %v1820_v6 = vpop.f32.mrf.mxu0 }
 0x48b   : > { %v1821_v7 = vadd.f32 %v1820_v6, %v1250_v47 }
 0x48c   : > { %v1830_v8 = vmax.f32 %v1828_v62, %v1829_v3  ;;  %v1835_v9 = vmax.f32 %v1833_v63, %v1834_v4  ;;  %v1840_v11 = vmax.f32 %v1838_v1, %v1839_v5  ;;  %v4262_v12 = vpop.f32.mrf.mxu0 }
 0x48d   : > { %v1845_v13 = vsel %vm1531_vm3, %v1821_v7, -inf }
 0x48e   : > { %v1852_v14 = vsub.f32 %v1602_v49, %v1830_v8  ;;  %v1836_v15 = vrot.slane %v1835_v9, 1  ;;  %v1841_v16 = vrot.slane %v1840_v11, 2  ;;  %v1846_v17 = vrot.slane %v1845_v13, 4 }
 0x490   : > { %v1856_v18 = vmul.f32 1.442695, %v1852_v14  ;;  %v1837_v19 = vmax.f32 %v1835_v9, %v1836_v15  ;;  %v1842_v20 = vmax.f32 %v1840_v11, %v1841_v16  ;;  %v1847_v21 = vmax.f32 %v1845_v13, %v1846_v17  ;;  %v2226_v15 = vld [vmem:[%s5275_s18 + $0x10] sm:$0xff]  ;;  %v2224_v16 = vld [vmem:[%s5275_s18] sm:$0xff] }
 0x492   : > { %4534 = vpow2.f32 %v1856_v18  ;;  %v1853_v22 = vsub.f32 %v1675_v54, %v1837_v19  ;;  %v1843_v23 = vrot.slane %v1842_v20, 1  ;;  %v1848_v24 = vrot.slane %v1847_v21, 2 }
 0x494   : > { %v1858_v25 = vmul.f32 1.442695, %v1853_v22  ;;  %v1844_v26 = vmax.f32 %v1842_v20, %v1843_v23  ;;  %v1849_v27 = vmax.f32 %v1847_v21, %v1848_v24 }
 0x496   : > { %4536 = vpow2.f32 %v1858_v25  ;;  %v1854_v28 = vsub.f32 %v1748_v61, %v1844_v26  ;;  %v1850_v29 = vrot.slane %v1849_v27, 1  ;;  %v4123_v25 = vld [vmem:[%s5823_s27] ss:$0 sm:$0xff] }
 0x498   : > { %v1860_v30 = vmul.f32 1.442695, %v1854_v28  ;;  %v1851_v31 = vmax.f32 %v1849_v27, %v1850_v29 }
 0x49a   : > { %4538 = vpow2.f32 %v1860_v30  ;;  %v1855_v32 = vsub.f32 %v1821_v7, %v1851_v31  ;;  %v2461_v31 = vld [vmem:[%s5234_s13 + $0x18] sm:$0xff] }
 0x49c   : > { %v1862_v33 = vmul.f32 1.442695, %v1855_v32  ;;  %v2460_v32 = vld [vmem:[%s5234_s13 + $0x10] sm:$0xff] }
 0x49e   : > { %4540 = vpow2.f32 %v1862_v33  ;;  %v2459_v33 = vld [vmem:[%s5234_s13 + $0x8] sm:$0xff] }
 0x49f   : > { %v4535_v34 = vpop.eup %4534 }
 0x4a0   : > { %v1864_v35 = vsel %vm1531_vm3, %v4535_v34, 0.0 }
 0x4a1   : > { %v1865_v36 = vrot.slane %v1864_v35, 4 }
 0x4a3   : > { %v4537_v41 = vpop.eup %4536  ;;  %v1866_v42 = vadd.f32 %v1865_v36, %v1864_v35  ;;  %v1249_v35 = vld [vmem:[#allocation3] sm:$0xff] }
 0x4a4   : > { %v1871_v43 = vsel %vm1531_vm3, %v4537_v41, 0.0 }
 0x4a5   : > { %v1867_v44 = vrot.slane %v1866_v42, 2  ;;  %v1872_v45 = vrot.slane %v1871_v43, 4 }
 0x4a7   : > { %v4539_v46 = vpop.eup %4538  ;;  %v1868_v47 = vadd.f32 %v1867_v44, %v1866_v42  ;;  %v1873_v48 = vadd.f32 %v1872_v45, %v1871_v43  ;;  %v2341_v44 = vld [vmem:[%s5292_s30 + $0x18] sm:$0xff]  ;;  %v2340_v45 = vld [vmem:[%s5292_s30 + $0x10] sm:$0xff] }
 0x4a8   : > { %v1878_v49 = vsel %vm1531_vm3, %v4539_v46, 0.0 }
 0x4a9   : > { %v1869_v50 = vrot.slane %v1868_v47, 1  ;;  %v1874_v51 = vrot.slane %v1873_v48, 2  ;;  %v1879_v52 = vrot.slane %v1878_v49, 4 }
 0x4ab   : > { %v4541_v53 = vpop.eup %4540  ;;  %v1875_v54 = vadd.f32 %v1874_v51, %v1873_v48  ;;  %v1880_v55 = vadd.f32 %v1879_v52, %v1878_v49  ;;  %v1870_v56 = vadd.f32 %v1869_v50, %v1868_v47  ;;  %v2338_v47 = vld [vmem:[%s5292_s30] sm:$0xff] }
 0x4ac   : > { %v1885_v57 = vsel %vm1531_vm3, %v4541_v53, 0.0  ;;  %v4129_v48 = vld [vmem:[%s5825_s10] ss:$0 sm:$0xff] }
 0x4ad   : > { %v1876_v58 = vrot.slane %v1875_v54, 1  ;;  %v1881_v59 = vrot.slane %v1880_v55, 2  ;;  %v1886_v60 = vrot.slane %v1885_v57, 4  ;;  %4542 = vrcp.f32 %v1870_v56  ;;  %v4125_v56 = vld [vmem:[%s5827_s16] ss:$0 sm:$0xff] }
 0x4af   : > { %v1882_v61 = vadd.f32 %v1881_v59, %v1880_v55  ;;  %v1887_v62 = vadd.f32 %v1886_v60, %v1885_v57  ;;  %v1877_v63 = vadd.f32 %v1876_v58, %v1875_v54  ;;  %v4126_v58 = vld [vmem:[%s5829_s15] ss:$0 sm:$0xff] }
 0x4b1   : > { %v1883_v0 = vrot.slane %v1882_v61, 1  ;;  %v1888_v1 = vrot.slane %v1887_v62, 2  ;;  %4544 = vrcp.f32 %v1877_v63 }
 0x4b3   : > { %v1889_v3 = vadd.f32 %v1888_v1, %v1887_v62  ;;  %v1884_v4 = vadd.f32 %v1883_v0, %v1882_v61 }
 0x4b5   : > { %v1890_v5 = vrot.slane %v1889_v3, 1  ;;  %4546 = vrcp.f32 %v1884_v4 }
 0x4b7   : > { %v1891_v6 = vadd.f32 %v1890_v5, %v1889_v3 }
 0x4b9   : > { %4548 = vrcp.f32 %v1891_v6  ;;  %v1251_v6 = vld [vmem:[%s5830_s5] sm:$0xff] }
 0x4ba   : > { %v4543_v7 = vpop.eup %4542 }
 0x4bb   : > { %v1893_v8 = vmul.f32 %v4543_v7, %v4535_v34  ;;  %v2458_v34 = vld [vmem:[%s5234_s13] sm:$0xff]  ;;  %v4849_v7 = vmov 0  }
 0x4bd   : > { %4264 = vmatpush3.msra.mxu1 %v1893_v8 }
 0x4be   : > { %v4545_v9 = vpop.eup %4544  ;;  %4266 = vmatmul.mubr.msk.f32.vlgmr.msra.gmra.mxu1 %vm1531_vm3, %v5378_v37  ;;  %4273 = vmatprep.subr.mxu1 %v4847_v10 }
 0x4bf   : > { %v1895_v11 = vmul.f32 %v4545_v9, %v4537_v41  ;;  %4275 = vmatprep.mubr.msk.f32.mxu1 %vm4848_vm2, %v4847_v10 }
 0x4c1   : > { %4269 = vmatpush3.msra.mxu0 %v1895_v11 }
 0x4c2   : > { %v4547_v12 = vpop.eup %4546  ;;  %4271 = vmatmul.mubr.msk.f32.vlgmr.msra.gmra.mxu0 %vm1531_vm3, %v5380_v38  ;;  %4278 = vmatprep.subr.mxu0 %v4847_v10  ;;  %v2227_v38 = vld [vmem:[%s5275_s18 + $0x18] sm:$0xff] }
 0x4c3   : > { %v1897_v13 = vmul.f32 %v4547_v12, %v4539_v46  ;;  %4280 = vmatprep.mubr.msk.f32.mxu0 %vm4848_vm2, %v4847_v10  ;;  %v2339_v46 = vld [vmem:[%s5292_s30 + $0x8] sm:$0xff] }
 0x4c5   : > { %4274 = vmatpush3.msra.mxu1 %v1897_v13 }
 0x4c6   : > { %v4549_v37 = vpop.eup %4548  ;;  %4276 = vmatmul.mubr.msk.f32.vlgmr.msra.gmra.mxu1 %vm1531_vm3, %v5382_v39  ;;  %4305 = vmatprep.subr.mxu1 %v4847_v10  ;;  %v2225_v39 = vld [vmem:[%s5275_s18 + $0x8] sm:$0xff]  ;;  %s5831_s18 = sld [smem:[#allocation46_spill]] }
 0x4c7   : > { %v1899_v14 = vmul.f32 %v4549_v37, %v4541_v53  ;;  %4313 = vmatprep.mubr.msk.f32.mxu1 %vm4848_vm2, %v4847_v10  ;;  %4306 = vmatpush3.msra.mxu1 %v2461_v31 }
 0x4c8   : > { %4307 = vmatprep.subr.mxu1 %v4847_v10 }
 0x4c9   : > { %4279 = vmatpush3.msra.mxu0 %v1899_v14  ;;  %4308 = vmatpush3.msra.mxu1 %v2460_v32 }
 0x4ca   : > { %4281 = vmatmul.mubr.msk.f32.vlgmr.msra.gmra.mxu0 %vm1531_vm3, %v5384_v40  ;;  %4283 = vmatprep.subr.mxu0 %v4847_v10 }
 0x4cb   : > { %4291 = vmatprep.mubr.msk.f32.mxu0 %vm4848_vm2, %v4847_v10  ;;  %4284 = vmatpush3.msra.mxu0 %v2227_v38 }
 0x4cc   : > { %4285 = vmatprep.subr.mxu0 %v4847_v10  ;;  %4309 = vmatprep.subr.mxu1 %v4847_v10  ;;  %s5832_s21 = scalar_lea.vmem %s5831_s18, %s5244_s1 }
 0x4cd   : > { %4286 = vmatpush3.msra.mxu0 %v2226_v15  ;;  %4310 = vmatpush3.msra.mxu1 %v2459_v33  ;;  %v4127_v1 = vld [vmem:[%s5832_s21] ss:$0 sm:$0xff] }
 0x4ce   : > { %4287 = vmatprep.subr.mxu0 %v4847_v10  ;;  %4311 = vmatprep.subr.mxu1 %v4847_v10 }
 0x4cf   : > { %4288 = vmatpush3.msra.mxu0 %v2225_v39  ;;  %4312 = vmatpush3.msra.mxu1 %v2458_v34 }
 0x4d0   : > { %4289 = vmatprep.subr.mxu0 %v4847_v10  ;;  %4314 = vmatmul.mubr.msk.f32.vlgmr.msra.gmra.mxu1 %vm1252_vm1, %v1249_v35 }
 0x4d1   : > { %4290 = vmatpush3.msra.mxu0 %v2224_v16  ;;  %4326 = vmatprep.subr.mxu1 %v4847_v10 }
 0x4d2   : > { %4294 = vmatprep.subr.mxu0 %v4847_v10  ;;  %4328 = vmatprep.mubr.msk.f32.mxu1 %vm4848_vm2, %v4847_v10 }
 0x57e   : > { %v1969_v40 = vpop.f32.mrf.mxu1 }
 0x57f   : > { %2192 = vxpose.xlu1.b32.start [1/4] (short) (narrow) %v1969_v40, 8 }
 0x580   : > { %v4267_v17 = vpop.f32.mrf.mxu1 }
 0x582   : > { %v2042_v18 = vpop.f32.mrf.mxu0 }
 0x583   : > { %2193 = vxpose.xlu1.b32.cont [2/4] (short) (narrow) %v2042_v18, 8 }
 0x584   : > { %v4272_v19 = vpop.f32.mrf.mxu0 }
 0x586   : > { %v2115_v20 = vpop.f32.mrf.mxu1 }
 0x587   : > { %2194 = vxpose.xlu1.b32.cont [3/4] (short) (narrow) %v2115_v20, 8 }
 0x588   : > { %v4277_v21 = vpop.f32.mrf.mxu1 }
 0x58a   : > { %v2188_v22 = vpop.f32.mrf.mxu0 }
 0x58b   : > { %2195 = vxpose.xlu1.b32.end [4/4] (short) (narrow) %v2188_v22, 8 }
 0x58c   : > { %v4282_v23 = vpop.f32.mrf.mxu0 }
 0x590   : > { %v2538_v49 = vpop.f32.mrf.mxu1 }
 0x591   : > { %v2539_v50 = vadd.f32 %v4129_v48, %v2538_v49 }
 0x592   : > { %v4315_v51 = vpop.f32.mrf.mxu1 }
 0x5fb   : > { %v2208_v24 = vpop.trf.xlu1 }
 0x5fc   : > { %4292 = vmatmul.mubr.msk.f32.vlgmr.msra.gmra.mxu0 %vm1252_vm1, %v2208_v24 }
 0x5fd   : > { %4302 = vmatprep.mubr.msk.f32.mxu0 %vm4848_vm2, %v4847_v10  ;;  %4295 = vmatpush3.msra.mxu0 %v2341_v44 }
 0x5fe   : > { %4296 = vmatprep.subr.mxu0 %v4847_v10 }
 0x5ff   : > { %4297 = vmatpush3.msra.mxu0 %v2340_v45 }
 0x600   : > { %4298 = vmatprep.subr.mxu0 %v4847_v10 }
 0x601   : > { %4299 = vmatpush3.msra.mxu0 %v2339_v46 }
 0x602   : > { %4300 = vmatprep.subr.mxu0 %v4847_v10 }
 0x603   : > { %4301 = vmatpush3.msra.mxu0 %v2338_v47 }
 0x604   : > { %4316 = vmatprep.subr.mxu0 %v4847_v10 }
 0x6bc   : > { %v2304_v26 = vpop.f32.mrf.mxu0 }
 0x6bd   : > { %v2305_v27 = vadd.f32 %v4123_v25, %v2304_v26 }
 0x6be   : > { %v4293_v28 = vpop.f32.mrf.mxu0 }
 0x6bf   : > { %v5445_v29 = vadd.f32 %v2305_v27, %v5338_v2 }
 0x6c1   : > { %v2309_v30 = vsel %vm1252_vm1, %v5445_v29, 0.0 }
 0x6c2   : > { %2310 = vadd.xlane.f32.xlu0 %v2309_v30 }
 0x6ef   : > { %2542 = vxpose.xlu0.b32.start.end [1/1] (short) (narrow) %v2539_v50, 64 }
 0x74b   : > { %v2311_v2 = vpop.xlane.xlu0 %2310 }
 0x74c   : > { %v2312_v36 = vmul.f32 0.03125, %v2311_v2 }
 0x74e   : > { %v2313_v41 = vsub.f32 %v5445_v29, %v2312_v36 }
 0x750   : > { %v2314_v42 = vmul.f32 %v2313_v41, %v2313_v41 }
 0x752   : > { %v2315_v43 = vsel %vm1252_vm1, %v2314_v42, 0.0 }
 0x753   : > { %2316 = vadd.xlane.f32.xlu1 %v2315_v43 }
 0x76b   : > { %v2558_v61 = vpop.trf.xlu0 }
 0x76c   : > { %2574 = vxpose.xlu0.b32.start.end [1/1] (short) (narrow) %v2558_v61, 8 }
 0x76f   : > { %v2559_v62 = vpop.trf.xlu0 }
 0x773   : > { %v2560_v63 = vpop.trf.xlu0 }
 0x777   : > { %v2561_v0 = vpop.trf.xlu0 }
 0x778   : > { %2670 = vxpose.xlu0.b32.start.end [1/1] (short) (narrow) %v2561_v0, 8 }
 0x77b   : > { %v5495_v8 = vpop.trf.xlu0 }
 0x77f   : > { %v5497_v9 = vpop.trf.xlu0 }
 0x783   : > { %v5499_v11 = vpop.trf.xlu0 }
 0x786   : > { %2606 = vxpose.xlu1.b32.start.end [1/1] (short) (narrow) %v2559_v62, 8 }
 0x787   : > { %v5501_v13 = vpop.trf.xlu0 }
 0x7dc   : > { %v2317_v52 = vpop.xlane.xlu1 %2316 }
 0x7dd   : > { %v2318_v53 = vmul.f32 0.03125, %v2317_v52 }
 0x7df   : > { %v2319_v54 = vadd.f32 1e-05, %v2318_v53 }
 0x7e1   : > { %4550 = vrsqrt.f32 %v2319_v54 }
 0x7e8   : > { %v2590_v38 = vpop.trf.xlu0 }
 0x7ee   : > { %v4551_v55 = vpop.eup %4550 }
 0x7ef   : > { %v2321_v57 = vmul.f32 %v4551_v55, %v2313_v41 }
 0x7f1   : > { %v2329_v59 = vmul.f32 %v4125_v56, %v2321_v57 }
 0x7f3   : > { %v2337_v60 = vadd.f32 %v4126_v58, %v2329_v59 }
 0x7f4   : > { %v2686_v19 = vpop.trf.xlu0 }
 0x7f5   : > { %4303 = vmatmul.mubr.msk.f32.vlgmr.msra.gmra.mxu0 %vm1252_vm1, %v2337_v60 }
 0x7f6   : > { %4318 = vmatprep.mubr.msk.f32.mxu0 %vm4848_vm2, %v4847_v10 }
 0x802   : > { %v2622_v12 = vpop.trf.xlu1 }
 0x8b5   : > { %v2418_v3 = vpop.f32.mrf.mxu0 }
 0x8b6   : > { %v2419_v4 = vadd.f32 %v4127_v1, %v2418_v3 }
 0x8b7   : > { %v4304_v5 = vpop.f32.mrf.mxu0 }
 0x8b8   : > { %2422 = vxpose.xlu1.b32.start.end [1/1] (short) (narrow) %v2419_v4, 32 }
 0x8c5   : > { %2638 = vxpose.xlu1.b32.start.end [1/1] (short) (narrow) %v2560_v63, 8 }
 0x8e3   : > { %4530 = vset.pattern.permute.xlu1 %v4849_v7 }
 0x8e4   : > { %2704 = vperm.xlu1 %4530, %v1251_v6  }
 0x934   : > { %v2438_v37 = vpop.trf.xlu1 }
 0x935   : > { %v2454_v14 = vmul.f32 0.35355338, %v2438_v37 }
 0x937   : > { %4317 = vmatpush3.msra.mxu0 %v2454_v14 }
 0x938   : > { %4319 = vmatmul.mubr.msk.f32.vlgmr.msra.gmra.mxu0 %vm1531_vm3, %v2590_v38  ;;  %v2439_v15 = vpop.trf.xlu1  ;;  %4321 = vmatprep.subr.mxu0 %v4847_v10 }
 0x939   : > { %v2455_v39 = vmul.f32 0.35355338, %v2439_v15  ;;  %4323 = vmatprep.mubr.msk.f32.mxu0 %vm4848_vm2, %v4847_v10 }
 0x93b   : > { %4322 = vmatpush3.msra.mxu0 %v2455_v39 }
 0x93c   : > { %4324 = vmatmul.mubr.msk.f32.vlgmr.msra.gmra.mxu0 %vm1531_vm3, %v2622_v12  ;;  %v2440_v16 = vpop.trf.xlu1  ;;  %4331 = vmatprep.subr.mxu0 %v4847_v10 }
 0x93d   : > { %v2456_v40 = vmul.f32 0.35355338, %v2440_v16  ;;  %4333 = vmatprep.mubr.msk.f32.mxu0 %vm4848_vm2, %v4847_v10 }
 0x93f   : > { %4327 = vmatpush3.msra.mxu1 %v2456_v40 }
 0x940   : > { %v2441_v17 = vpop.trf.xlu1  ;;  %4336 = vmatprep.subr.mxu1 %v4847_v10 }
 0x941   : > { %v2457_v18 = vmul.f32 0.35355338, %v2441_v17 }
 0x943   : > { %4332 = vmatpush3.msra.mxu0 %v2457_v18 }
 0x944   : > { %4334 = vmatmul.mubr.msk.f32.vlgmr.msra.gmra.mxu0 %vm1531_vm3, %v2686_v19  ;;  %v2654_v20 = vpop.trf.xlu1  ;;  %4341 = vmatprep.subr.mxu0 %v4847_v10 }
 0x945   : > { %4329 = vmatmul.mubr.msk.f32.vlgmr.msra.gmra.mxu1 %vm1531_vm3, %v2654_v20  ;;  %4343 = vmatprep.mubr.msk.f32.mxu0 %vm4848_vm2, %v4847_v10 }
 0x946   : > { %4338 = vmatprep.mubr.msk.f32.mxu1 %vm4848_vm2, %v4847_v10 }
 0x95f   : > { %v2705_v21 = vpop.permute.xlu1 %2704 }
 0x9f8   : > { %v2776_v22 = vpop.f32.mrf.mxu0 }
 0x9f9   : > { %v2777_v23 = vadd.f32 %v2776_v22, %v2705_v21 }
 0x9fa   : > { %v4320_v24 = vpop.f32.mrf.mxu0 }
 0x9fb   : > { %v2999_v25 = vsel %vm1531_vm3, %v2777_v23, -inf }
 0x9fc   : > { %v3000_v26 = vrot.slane %v2999_v25, 4  ;;  %v2849_v27 = vpop.f32.mrf.mxu0 }
 0x9fd   : > { %v2850_v28 = vadd.f32 %v2849_v27, %v2705_v21 }
 0x9fe   : > { %v3001_v30 = vmax.f32 %v2999_v25, %v3000_v26  ;;  %v4325_v31 = vpop.f32.mrf.mxu0 }
 0x9ff   : > { %v3006_v32 = vsel %vm1531_vm3, %v2850_v28, -inf }
 0xa00   : > { %v3002_v33 = vrot.slane %v3001_v30, 2  ;;  %v3007_v34 = vrot.slane %v3006_v32, 4 }
 0xa02   : > { %v3003_v35 = vmax.f32 %v3001_v30, %v3002_v33  ;;  %v3008_v2 = vmax.f32 %v3006_v32, %v3007_v34 }
 0xa04   : > { %v3004_v36 = vrot.slane %v3003_v35, 1  ;;  %v3009_v41 = vrot.slane %v3008_v2, 2  ;;  %v2995_v42 = vpop.f32.mrf.mxu0 }
 0xa05   : > { %v2996_v43 = vadd.f32 %v2995_v42, %v2705_v21  ;;  %v2922_v44 = vpop.f32.mrf.mxu1 }
 0xa06   : > { %v3005_v45 = vmax.f32 %v3003_v35, %v3004_v36  ;;  %v3010_v46 = vmax.f32 %v3008_v2, %v3009_v41  ;;  %v2923_v47 = vadd.f32 %v2922_v44, %v2705_v21  ;;  %v4335_v48 = vpop.f32.mrf.mxu0 }
 0xa07   : > { %v3020_v49 = vsel %vm1531_vm3, %v2996_v43, -inf  ;;  %v4330_v50 = vpop.f32.mrf.mxu1 }
 0xa08   : > { %v3027_v51 = vsub.f32 %v2777_v23, %v3005_v45  ;;  %v3011_v52 = vrot.slane %v3010_v46, 1  ;;  %v3021_v53 = vrot.slane %v3020_v49, 4  ;;  %v3013_v54 = vsel %vm1531_vm3, %v2923_v47, -inf }
 0xa09   : > { %v3014_v55 = vrot.slane %v3013_v54, 4 }
 0xa0a   : > { %v3031_v56 = vmul.f32 1.442695, %v3027_v51  ;;  %v3012_v57 = vmax.f32 %v3010_v46, %v3011_v52  ;;  %v3022_v58 = vmax.f32 %v3020_v49, %v3021_v53 }
 0xa0b   : > { %v3015_v59 = vmax.f32 %v3013_v54, %v3014_v55 }
 0xa0c   : > { %4552 = vpow2.f32 %v3031_v56  ;;  %v3028_v60 = vsub.f32 %v2850_v28, %v3012_v57  ;;  %v3023_v61 = vrot.slane %v3022_v58, 2  ;;  %v3401_v56 = vld [vmem:[%s5329_s12 + $0x10] sm:$0xff]  ;;  %v3400_v57 = vld [vmem:[%s5329_s12 + $0x8] sm:$0xff] }
 0xa0d   : > { %v3016_v62 = vrot.slane %v3015_v59, 2 }
 0xa0e   : > { %v3033_v63 = vmul.f32 1.442695, %v3028_v60  ;;  %v3024_v0 = vmax.f32 %v3022_v58, %v3023_v61 }
 0xa0f   : > { %v3017_v1 = vmax.f32 %v3015_v59, %v3016_v62 }
 0xa10   : > { %4554 = vpow2.f32 %v3033_v63  ;;  %v3025_v3 = vrot.slane %v3024_v0, 1 }
 0xa11   : > { %v3018_v4 = vrot.slane %v3017_v1, 1 }
 0xa12   : > { %v3026_v5 = vmax.f32 %v3024_v0, %v3025_v3  ;;  %v4139_v3 = vld [vmem:[%s1221_s7] ss:$0 sm:$0xff] }
 0xa13   : > { %v3019_v6 = vmax.f32 %v3017_v1, %v3018_v4 }
 0xa14   : > { %v3030_v12 = vsub.f32 %v2996_v43, %v3026_v5 }
 0xa15   : > { %v3029_v37 = vsub.f32 %v2923_v47, %v3019_v6 }
 0xa16   : > { %v3037_v14 = vmul.f32 1.442695, %v3030_v12 }
 0xa17   : > { %v3035_v38 = vmul.f32 1.442695, %v3029_v37 }
 0xa18   : > { %4556 = vpow2.f32 %v3037_v14 }
 0xa19   : > { %v4553_v15 = vpop.eup %4552  ;;  %4558 = vpow2.f32 %v3035_v38 }
 0xa1a   : > { %v3039_v39 = vsel %vm1531_vm3, %v4553_v15, 0.0 }
 0xa1b   : > { %v3040_v16 = vrot.slane %v3039_v39, 4 }
 0xa1d   : > { %v4555_v40 = vpop.eup %4554  ;;  %v3041_v17 = vadd.f32 %v3040_v16, %v3039_v39  ;;  %v3516_v16 = vld [vmem:[%s5332_s3 + $0x18] sm:$0xff] }
 0xa1e   : > { %v3046_v18 = vsel %vm1531_vm3, %v4555_v40, 0.0 }
 0xa1f   : > { %v3042_v19 = vrot.slane %v3041_v17, 2  ;;  %v3047_v20 = vrot.slane %v3046_v18, 4 }
 0xa21   : > { %v3043_v21 = vadd.f32 %v3042_v19, %v3041_v17  ;;  %v3048_v22 = vadd.f32 %v3047_v20, %v3046_v18  ;;  %v3513_v17 = vld [vmem:[%s5332_s3] sm:$0xff]  ;;  %v3605_v18 = vld [vmem:[%s5326_s19 + $0x38] sm:$0xff]  ;;  %v3604_v19 = vld [vmem:[%s5326_s19 + $0x30] sm:$0xff] }
 0xa22   : > { %v3603_v20 = vld [vmem:[%s5326_s19 + $0x28] sm:$0xff] }
 0xa23   : > { %v3044_v23 = vrot.slane %v3043_v21, 1  ;;  %v3049_v24 = vrot.slane %v3048_v22, 2 }
 0xa25   : > { %v4557_v25 = vpop.eup %4556  ;;  %v3050_v26 = vadd.f32 %v3049_v24, %v3048_v22  ;;  %v3045_v27 = vadd.f32 %v3044_v23, %v3043_v21  ;;  %v3602_v21 = vld [vmem:[%s5326_s19 + $0x20] sm:$0xff]  ;;  %v3601_v22 = vld [vmem:[%s5326_s19 + $0x18] sm:$0xff] }
 0xa26   : > { %v4559_v28 = vpop.eup %4558  ;;  %v3060_v30 = vsel %vm1531_vm3, %v4557_v25, 0.0 }
 0xa27   : > { %v3051_v31 = vrot.slane %v3050_v26, 1  ;;  %v3061_v32 = vrot.slane %v3060_v30, 4  ;;  %v3053_v33 = vsel %vm1531_vm3, %v4559_v28, 0.0  ;;  %4560 = vrcp.f32 %v3045_v27  ;;  %v4141_v27 = vld [vmem:[%s1224_s9] ss:$0 sm:$0xff] }
 0xa28   : > { %v3054_v34 = vrot.slane %v3053_v33, 4 }
 0xa29   : > { %v3062_v35 = vadd.f32 %v3061_v32, %v3060_v30  ;;  %v3052_v2 = vadd.f32 %v3051_v31, %v3050_v26  ;;  %v4142_v30 = vld [vmem:[%s1227_s23] ss:$0 sm:$0xff] }
 0xa2a   : > { %v3055_v36 = vadd.f32 %v3054_v34, %v3053_v33  ;;  %v3600_v33 = vld [vmem:[%s5326_s19 + $0x10] sm:$0xff]  ;;  %v3599_v34 = vld [vmem:[%s5326_s19 + $0x8] sm:$0xff] }
 0xa2b   : > { %v3063_v41 = vrot.slane %v3062_v35, 2  ;;  %4562 = vrcp.f32 %v3052_v2  ;;  %v4143_v2 = vld [vmem:[%s1230_s24] ss:$0 sm:$0xff] }
 0xa2c   : > { %v3056_v42 = vrot.slane %v3055_v36, 2 }
 0xa2d   : > { %v3064_v43 = vadd.f32 %v3063_v41, %v3062_v35  ;;  %v3598_v35 = vld [vmem:[%s5326_s19] sm:$0xff] }
 0xa2e   : > { %v3057_v44 = vadd.f32 %v3056_v42, %v3055_v36 }
 0xa2f   : > { %v3065_v45 = vrot.slane %v3064_v43, 1 }
 0xa30   : > { %v3058_v46 = vrot.slane %v3057_v44, 1 }
 0xa31   : > { %v3066_v47 = vadd.f32 %v3065_v45, %v3064_v43 }
 0xa32   : > { %v3059_v48 = vadd.f32 %v3058_v46, %v3057_v44  ;;  %v4145_v44 = vld [vmem:[%s1238_s4] ss:$0 sm:$0xff] }
 0xa33   : > { %4564 = vrcp.f32 %v3066_v47 }
 0xa34   : > { %v4561_v49 = vpop.eup %4560  ;;  %4566 = vrcp.f32 %v3059_v48 }
 0xa35   : > { %v3068_v50 = vmul.f32 %v4561_v49, %v4553_v15 }
 0xa37   : > { %4337 = vmatpush3.msra.mxu1 %v3068_v50 }
 0xa38   : > { %v4563_v51 = vpop.eup %4562  ;;  %4339 = vmatmul.mubr.msk.f32.vlgmr.msra.gmra.mxu1 %vm1531_vm3, %v5495_v8  ;;  %4346 = vmatprep.subr.mxu1 %v4847_v10 }
 0xa39   : > { %v3070_v52 = vmul.f32 %v4563_v51, %v4555_v40  ;;  %4348 = vmatprep.mubr.msk.f32.mxu1 %vm4848_vm2, %v4847_v10  ;;  %v3514_v40 = vld [vmem:[%s5332_s3 + $0x8] sm:$0xff] }
 0xa3b   : > { %4342 = vmatpush3.msra.mxu0 %v3070_v52 }
 0xa3c   : > { %4344 = vmatmul.mubr.msk.f32.vlgmr.msra.gmra.mxu0 %vm1531_vm3, %v5497_v9  ;;  %4351 = vmatprep.subr.mxu0 %v4847_v10  ;;  %v3402_v9 = vld [vmem:[%s5329_s12 + $0x18] sm:$0xff] }
 0xa3d   : > { %4353 = vmatprep.mubr.msk.f32.mxu0 %vm4848_vm2, %v4847_v10 }
 0xa40   : > { %v4565_v53 = vpop.eup %4564 }
 0xa41   : > { %v4567_v8 = vpop.eup %4566  ;;  %v3074_v54 = vmul.f32 %v4565_v53, %v4557_v25 }
 0xa42   : > { %v3072_v55 = vmul.f32 %v4567_v8, %v4559_v28 }
 0xa43   : > { %4352 = vmatpush3.msra.mxu0 %v3074_v54 }
 0xa44   : > { %4347 = vmatpush3.msra.mxu1 %v3072_v55  ;;  %4354 = vmatmul.mubr.msk.f32.vlgmr.msra.gmra.mxu0 %vm1531_vm3, %v5501_v13 }
 0xa45   : > { %4349 = vmatmul.mubr.msk.f32.vlgmr.msra.gmra.mxu1 %vm1531_vm3, %v5499_v11  ;;  %4356 = vmatprep.subr.mxu1 %v4847_v10  ;;  %v3399_v11 = vld [vmem:[%s5329_s12] sm:$0xff] }
 0xa46   : > { %4364 = vmatprep.mubr.msk.f32.mxu1 %vm4848_vm2, %v4847_v10  ;;  %4367 = vmatprep.subr.mxu0 %v4847_v10 }
 0xa47   : > { %4375 = vmatprep.mubr.msk.f32.mxu0 %vm4848_vm2, %v4847_v10  ;;  %4357 = vmatpush3.msra.mxu1 %v3402_v9 }
 0xa48   : > { %4358 = vmatprep.subr.mxu1 %v4847_v10  ;;  %4368 = vmatpush3.msra.mxu0 %v3516_v16 }
 0xa49   : > { %4359 = vmatpush3.msra.mxu1 %v3401_v56  ;;  %4369 = vmatprep.subr.mxu0 %v4847_v10 }
 0xa4a   : > { %4360 = vmatprep.subr.mxu1 %v4847_v10 }
 0xa4b   : > { %4361 = vmatpush3.msra.mxu1 %v3400_v57 }
 0xa4c   : > { %4362 = vmatprep.subr.mxu1 %v4847_v10 }
 0xa4d   : > { %4363 = vmatpush3.msra.mxu1 %v3399_v11 }
 0xa4e   : > { %4378 = vmatprep.subr.mxu1 %v4847_v10 }
 0xaf8   : > { %v3144_v13 = vpop.f32.mrf.mxu1 }
 0xaf9   : > { %3367 = vxpose.xlu0.b32.start [1/4] (short) (narrow) %v3144_v13, 8 }
 0xafa   : > { %v4340_v58 = vpop.f32.mrf.mxu1 }
 0xafc   : > { %v3217_v59 = vpop.f32.mrf.mxu0 }
 0xafd   : > { %3368 = vxpose.xlu0.b32.cont [2/4] (short) (narrow) %v3217_v59, 8 }
 0xafe   : > { %v4345_v60 = vpop.f32.mrf.mxu0 }
 0xb04   : > { %v3363_v61 = vpop.f32.mrf.mxu0 }
 0xb05   : > { %v3290_v62 = vpop.f32.mrf.mxu1 }
 0xb06   : > { %3369 = vxpose.xlu0.b32.cont [3/4] (short) (narrow) %v3290_v62, 8  ;;  %v4355_v63 = vpop.f32.mrf.mxu0 }
 0xb07   : > { %v4350_v0 = vpop.f32.mrf.mxu1 }
 0xb0a   : > { %3370 = vxpose.xlu0.b32.end [4/4] (short) (narrow) %v3363_v61, 8 }
 0xb33   : > { %4531 = vset.pattern.permute.xlu0 %v4849_v7 }
 0xb7a   : > { %v3383_v1 = vpop.trf.xlu0 }
 0xb7b   : > { %4365 = vmatmul.mubr.msk.f32.vlgmr.msra.gmra.mxu1 %vm1252_vm1, %v3383_v1 }
 0xb7c   : > { %4394 = vmatprep.mubr.msk.f32.mxu1 %vm4848_vm2, %v4847_v10  ;;  %4379 = vmatpush3.msra.mxu1 %v3605_v18 }
 0xb7d   : > { %4380 = vmatprep.subr.mxu1 %v4847_v10 }
 0xb7e   : > { %4381 = vmatpush3.msra.mxu1 %v3604_v19 }
 0xb7f   : > { %4382 = vmatprep.subr.mxu1 %v4847_v10 }
 0xb80   : > { %4383 = vmatpush3.msra.mxu1 %v3603_v20 }
 0xb81   : > { %4384 = vmatprep.subr.mxu1 %v4847_v10 }
 0xb82   : > { %4385 = vmatpush3.msra.mxu1 %v3602_v21 }
 0xb83   : > { %4386 = vmatprep.subr.mxu1 %v4847_v10 }
 0xb84   : > { %4387 = vmatpush3.msra.mxu1 %v3601_v22 }
 0xb85   : > { %4388 = vmatprep.subr.mxu1 %v4847_v10 }
 0xb86   : > { %4389 = vmatpush3.msra.mxu1 %v3600_v33 }
 0xb87   : > { %4390 = vmatprep.subr.mxu1 %v4847_v10 }
 0xb88   : > { %4391 = vmatpush3.msra.mxu1 %v3599_v34 }
 0xb89   : > { %4392 = vmatprep.subr.mxu1 %v4847_v10 }
 0xb8a   : > { %4393 = vmatpush3.msra.mxu1 %v3598_v35 }
 0xc3b   : > { %v3479_v4 = vpop.f32.mrf.mxu1 }
 0xc3c   : > { %v3480_v5 = vadd.f32 %v4139_v3, %v3479_v4 }
 0xc3d   : > { %v4366_v6 = vpop.f32.mrf.mxu1 }
 0xc3e   : > { %v5565_v12 = vadd.f32 %v3480_v5, %v5445_v29  ;;  %v3515_v29 = vld [vmem:[%s5332_s3 + $0x10] sm:$0xff] }
 0xc3f   : > { %4370 = vmatpush3.msra.mxu0 %v3515_v29 }
 0xc40   : > { %v3484_v7 = vsel %vm1252_vm1, %v5565_v12, 0.0  ;;  %4371 = vmatprep.subr.mxu0 %v4847_v10 }
 0xc41   : > { %3485 = vadd.xlane.f32.xlu0 %v3484_v7  ;;  %4372 = vmatpush3.msra.mxu0 %v3514_v40 }
 0xc42   : > { %4373 = vmatprep.subr.mxu0 %v4847_v10 }
 0xc43   : > { %4374 = vmatpush3.msra.mxu0 %v3513_v17 }
 0xcca   : > { %v3486_v37 = vpop.xlane.xlu0 %3485 }
 0xccb   : > { %v3487_v14 = vmul.f32 0.03125, %v3486_v37 }
 0xccd   : > { %v3488_v38 = vsub.f32 %v5565_v12, %v3487_v14 }
 0xccf   : > { %v3489_v15 = vmul.f32 %v3488_v38, %v3488_v38 }
 0xcd1   : > { %v3490_v39 = vsel %vm1252_vm1, %v3489_v15, 0.0 }
 0xcd2   : > { %3491 = vadd.xlane.f32.xlu1 %v3490_v39 }
 0xd5b   : > { %v3492_v23 = vpop.xlane.xlu1 %3491 }
 0xd5c   : > { %v3493_v24 = vmul.f32 0.03125, %v3492_v23 }
 0xd5e   : > { %v3494_v25 = vadd.f32 1e-05, %v3493_v24 }
 0xd60   : > { %4568 = vrsqrt.f32 %v3494_v25 }
 0xd6d   : > { %v4569_v26 = vpop.eup %4568 }
 0xd6e   : > { %v3496_v28 = vmul.f32 %v4569_v26, %v3488_v38 }
 0xd70   : > { %v3504_v31 = vmul.f32 %v4141_v27, %v3496_v28 }
 0xd72   : > { %v3512_v32 = vadd.f32 %v4142_v30, %v3504_v31 }
 0xd74   : > { %4376 = vmatmul.mubr.msk.f32.vlgmr.msra.gmra.mxu0 %vm1252_vm1, %v3512_v32 }
 0xe34   : > { %v3593_v36 = vpop.f32.mrf.mxu0 }
 0xe35   : > { %v3594_v41 = vadd.f32 %v4143_v2, %v3593_v36 }
 0xe36   : > { %v4377_v42 = vpop.f32.mrf.mxu0 }
 0xe37   : > { %v3597_v43 = vmax.f32 %v3594_v41, 0.0 }
 0xe39   : > { %4395 = vmatmul.mubr.msk.f32.vlgmr.msra.gmra.mxu1 %vm3613_vm4, %v3597_v43 }
 0xef9   : > { %v3683_v45 = vpop.f32.mrf.mxu1 }
 0xefa   : > { %v3684_v46 = vadd.f32 %v4145_v44, %v3683_v45  ;;  %3692 = sbr.rel (%p4147_p1) target bundleno = 4148 (0x1034), region = 152 }
 0xefb   : > { %v4396_v10 = vpop.f32.mrf.mxu1 }
 0xefc   : > { %v3687_v47 = vadd.f32 %v3684_v46, %v5565_v12 }
 0xefe   : > { %3688 = vst.msk [vmem:[#allocation2] sm:$0xff] %vm1252_vm1, %v3687_v47 }
 0xeff   : > { %v3693_v48 = vsel %vm1252_vm1, %v3687_v47, 0.0  ;;  %v4148_v56 = vld [vmem:[%s5838_s29] ss:$0 sm:$0xff] }
 0xf00   : > { %3694 = vadd.xlane.f32.xlu0 %v3693_v48  ;;  %v4149_v11 = vld [vmem:[%s5839_s22] ss:$0 sm:$0xff] }
 0xf89   : > { %v3695_v49 = vpop.xlane.xlu0 %3694 }
 0xf8a   : > { %v3696_v50 = vmul.f32 0.03125, %v3695_v49 }
 0xf8c   : > { %v3697_v51 = vsub.f32 %v3687_v47, %v3696_v50 }
 0xf8e   : > { %v3698_v52 = vmul.f32 %v3697_v51, %v3697_v51 }
 0xf90   : > { %v3699_v53 = vsel %vm1252_vm1, %v3698_v52, 0.0 }
 0xf91   : > { %3700 = vadd.xlane.f32.xlu0 %v3699_v53 }
0x101a   : > { %v3701_v8 = vpop.xlane.xlu0 %3700 }
0x101b   : > { %v3702_v54 = vmul.f32 0.03125, %v3701_v8 }
0x101d   : > { %v3703_v55 = vadd.f32 1e-05, %v3702_v54 }
0x101f   : > { %4570 = vrsqrt.f32 %v3703_v55 }
0x102c   : > { %v4571_v9 = vpop.eup %4570 }
0x102d   : > { %v3705_v57 = vmul.f32 %v4571_v9, %v3697_v51 }
0x102f   : > { %v3713_v13 = vmul.f32 %v4148_v56, %v3705_v57 }
0x1031   : > { %v3721_v58 = vadd.f32 %v4149_v11, %v3713_v13 }
0x1033   : > { %3722 = vst.msk [vmem:[%s1171_s26] sm:$0xff] %vm1252_vm1, %v3721_v58 }
0x1034 PF: > { %s5840_s28 = sld [smem:[#allocation22_spill]]  ;;  %s3737_s12 = sshll.u32 %s1171_s26, 4  ;;  %s3738_s12 = int_to_ptr.vmem [resolvable:$true] %s3737_s12 }
0x1035   : > { %s5841_s2 = sld [smem:[#allocation20_spill]]  ;;  %s4710_s7 = scalar_lea.vmem %s3738_s12, 128 }
0x1036   : > { %s5842_s15 = sld [smem:[#allocation30_spill]]  ;;  %p4711_p10 = scmp.ne.s32.totalorder %s3738_s12, %s4710_s7 }
0x1037   : > { %s5843_s18 = sld [smem:[#allocation59_spill]]  ;;  %s4850_s3 = smov [#allocation12]  }
0x1038   : > { %s4714_s13 = sshll.u32 %s4850_s3, 4  ;;  %s4715_s13 = int_to_ptr.vmem [resolvable:$false] %s4714_s13 }
0x1039   : > { %s4716_s11 = scalar_lea.vmem %s4715_s13, 256  ;;  %p4717_p3 = scmp.lt.s32.totalorder %s3738_s12, %s4715_s13 }
0x103a   : > { %s4151_s5 = sshll.u32 %s5840_s28, 7  ;;  %p4718_p6 = scmp.lt.s32.totalorder %s4716_s11, %s4710_s7 }
0x103b   : > { %s5844_s0 = sand.u32 1, %s5841_s2  }
0x103c   : > { %s3724_s27 = scalar_lea.sflag [#allocation6], %s5844_s0  ;;  %p5845_p0 = scmp.ne.s32.totalorder %s5842_s15, 0 }
0x103d   : > { %s3735_s21 = scalar_lea.hbm %s5843_s18, %s4151_s5  ;;  %p4719_p5 = por %p4718_p6, %p4717_p3 }
0x103e   : > { %p4712_p12 = pnand %p4711_p10, %p5845_p0 }
0x1040   : > { %p4713_p2 = pneg %p4712_p12 }
0x1042   : > { %p4720_p8 = pnand %p4719_p5, %p4713_p2 }
0x1044   : > { %4723 = shalt.err (!%p4720_p8)
}
0x1045   : > { %s4724_s8 = scalar_lea.hbm %s3735_s21, 128  ;;  %s4728_s10 = scalar_lea.hbm %s5843_s18, 256 }
0x1046   : > { %p4725_p9 = scmp.ne.s32.totalorder %s3735_s21, %s4724_s8  ;;  %p4729_p4 = scmp.lt.s32.totalorder %s3735_s21, %s5843_s18 }
0x1047   : > { %p4730_p13 = scmp.lt.s32.totalorder %s4728_s10, %s4724_s8 }
0x1048   : > { %p4726_p11 = pnand %p4725_p9, %p5845_p0 }
0x1049   : > { %p4731_p1 = por %p4730_p13, %p4729_p4 }
0x104a   : > { %p4727_p7 = pneg %p4726_p11 }
0x104c   : > { %p4732_p10 = pnand %p4731_p1, %p4727_p7 }
0x104e   : > { %4735 = shalt.err (!%p4732_p10)
}
0x104f   : > { %4409 = dma.vmem_to_hbm [thread:$0]  (%p5845_p0), %s3738_s12, 128, %s3735_s21, %s3724_s27  }
0x1050 PF: > { %s5846_s25 = sld [smem:[#allocation25_spill]] }
0x1051   : > { %s5847_s23 = sld [smem:[#allocation19_spill]] }
0x1052   : > { %s5848_s14 = sld [smem:[#allocation31_spill]] }
0x1056   : > { %p4435_p12 = scmp.ge.s32.totalorder %s5846_s25, 2 }
0x1057   : > { %s3749_s16 = sand.u32 1, %s5847_s23  }
0x1058   : > { %p5849_p2 = scmp.ne.s32.totalorder %s5848_s14, 0  ;;  %s3750_s1 = scalar_lea.sflag [#allocation6], %s3749_s16 }
0x105a   : > { %p4429_p3 = pnand %p4435_p12, %p5849_p2 }
0x105c   : > { %p4430_p6 = pneg %p4429_p3 }
0x105e   : > { %4793 = dma.done.wait (%p4430_p6), %s3750_s1, 128  }
0x105f   : > { %4795 = vsyncadd (%p4430_p6), %s3750_s1, 4294967168  ;;  %s43_s2 = sadd.s32 1, %s5846_s25   ;;  %s5850_s27 = sld [smem:[#allocation17_spill]] }
0x1060   : > { %p40_p5 = scmp.ge.s32.totalorder %s43_s2, 6   ;;  %s5851_s3 = sld [smem:[#allocation18_spill]] }
0x1061   : > { %s5852_s7 = sld [smem:[#allocation28_spill]] }
0x1062   : > { %s5853_s28 = sld [smem:[#allocation20_spill]] }
0x1063   : > { %s5854_s8 = sld [smem:[#allocation21_spill]] }
0x1064   : > { %s5855_s4 = sld [smem:[#allocation29_spill]]  ;;  %42 = sbr.rel (!%p40_p5) target bundleno = 38 (0x26), region = 271 }
0x1065   : > { %s5856_s29 = sld [smem:[#allocation23_spill]] }
0x1066   : > { %s5857_s0 = sld [smem:[#allocation24_spill]] }
0x1067   : > { %s5858_s9 = sld [smem:[#allocation26_spill]] }
0x1068   : > { %s5859_s30 = sld [smem:[#allocation27_spill]] }
0x1069   :  { %3755 = vsyncpa [#allocation5], 1 }
0x106a   :  { %3757 = vsyncpa [#allocation5 + $0x1], 1 }
0x106b   :  { %3758 = vsyncpa [#allocation8], 1 }
0x106c   :  { %3759 = vsyncpa [#allocation6], 1 }
0x106d   :  { %3761 = vsyncpa [#allocation6 + $0x1], 1 }

</bundles_post_ra>
